<compile_context>
chip_gen: v7x
topology: tpu7x:2x2x1
jax: 0.10.0
libtpu: 0.0.40
codegen_flags: <defaults>
</compile_context>

<pallas_src>
import functools

import jax
import jax.numpy as jnp
import numpy as np
from jax.experimental import pallas as pl
from jax.experimental.pallas import tpu as pltpu


# ------------------------------ packed-weight layout --------------------------- #

def _weight_layout(cin, cout):
    """Column layout of the single packed (Cout, K) weight/affine array."""
    sizes = (
        ("d1_w1", 9 * cin), ("d1_w2", 9 * cout), ("d1_ws", cin), ("d1_aff", 6),
        ("d2_w1", 9 * cout), ("d2_w2", 9 * cout), ("d2_aff", 4),
        ("e1_w1", 9 * cin), ("e1_w2", 9 * cout), ("e1_ws", cin), ("e1_aff", 6),
        ("e2_w1", 9 * cout), ("e2_w2", 9 * cout), ("e2_aff", 4),
    )
    layout, off = {}, 0
    for name, width in sizes:
        layout[name] = (off, width)
        off += width
    return layout, off


def _pack_weights(params, layout, cin, cout):
    """Pack every conv weight (transposed to (Cout, K)) and folded-BN affine into one array."""
    def t3x3(w):  # OIHW (co, ci, 3, 3) -> (co, 9*ci), column = (3*ky+kx)*ci + c
        return jnp.transpose(w, (0, 2, 3, 1)).reshape(cout, -1)

    pieces = {}
    for pfx, blocks in (("d", params["dec"]), ("e", params["edge"])):
        b1, b2 = blocks
        assert "ws" in b1, "subsampling block is assumed to have a projection skip"
        pieces[pfx + "1_w1"] = t3x3(b1["w1"])
        pieces[pfx + "1_w2"] = t3x3(b1["w2"])
        pieces[pfx + "1_ws"] = b1["ws"].reshape(cout, cin)
        pieces[pfx + "1_aff"] = jnp.stack(
            [b1["s1"], b1["b1"], b1["s2"], b1["b2"], b1["ss"], b1["bs"]], axis=1)
        pieces[pfx + "2_w1"] = t3x3(b2["w1"])
        pieces[pfx + "2_w2"] = t3x3(b2["w2"])
        pieces[pfx + "2_aff"] = jnp.stack(
            [b2["s1"], b2["b1"], b2["s2"], b2["b2"]], axis=1)

    cols = []
    for name, (_, width) in layout.items():
        piece = pieces[name].astype(jnp.float32)
        assert piece.shape == (cout, width), (name, piece.shape, width)
        cols.append(piece)
    return jnp.concatenate(cols, axis=1)


# ----------------------------------- kernel ------------------------------------ #

def _edge_attention_kernel(pre_f_ref, pre_e_ref, wpk_ref, msk_ref,
                           feat_out_ref, edges_out_ref, pad_ref,
                           *, cin, wo, layout, margin):
    """Whole EdgeAttentionModule for one batch element; all intermediates stay in VMEM/vregs.

    pre_*_ref : (10*cin, Ho*Wo)  rows [0, 9*cin)  = stride-2 im2col patches of the input
                                 rows [9*cin, ..) = stride-2 subsampled input (skip path)
    wpk_ref   : (cout, K)        packed transposed conv weights + folded-BN affines
    msk_ref   : (2, Ho*Wo)       column-boundary masks (left tap / right tap validity)
    pad_ref   : (cout, margin + Ho*Wo + margin) halo scratch; margins stay zero.
    """
    cout, howo = feat_out_ref.shape
    base = margin

    ml = msk_ref[0:1, :]          # (1, howo): column > 0
    mr = msk_ref[1:2, :]          # (1, howo): column < wo-1

    def seg(name):
        o, w = layout[name]
        return wpk_ref[:, o:o + w]

    def aff_cols(name, n):
        a = seg(name)
        return [a[:, i:i + 1] for i in range(n)]

    # Zero only the margins, once per grid step; the interior is always rewritten before use.
    zeros_m = jnp.zeros((cout, margin), jnp.float32)
    pad_ref[:, :margin] = zeros_m
    pad_ref[:, margin + howo:] = zeros_m

    def conv3x3(x, w_flat, scale, bias):
        """3x3 conv (pad=1, stride=1) + folded-BN affine at half resolution.

        x: (cout, howo) value, or None if the pad interior already holds the input.
        Returns (cout, howo) float32.
        """
        if x is not None:
            pad_ref[:, base:base + howo] = x
        taps = []
        for ky in range(3):
            for kx in range(3):
                d = (ky - 1) * wo + (kx - 1)
                t = pad_ref[:, base + d:base + d + howo]
                if kx == 0:
                    t = t * ml           # left tap invalid at column 0
                elif kx == 2:
                    t = t * mr           # right tap invalid at column wo-1
                taps.append(t)
        patches = jnp.concatenate(taps, axis=0)                    # (9*cout, howo)
        y = jnp.dot(w_flat, patches, preferred_element_type=jnp.float32)
        return y * scale + bias

    def branch(pre_ref, pfx):
        pat1 = pre_ref[:9 * cin, :].astype(jnp.float32)            # stride-2 im2col patches
        x_sub = pre_ref[9 * cin:, :].astype(jnp.float32)           # (cin, howo) subsampled input

        # ---- block 1: conv3x3(stride 2)+BN+ReLU -> conv3x3+BN, 1x1 projection skip ----
        s1, b1, s2, b2, ss, bs = aff_cols(pfx + "1_aff", 6)
        y1 = jnp.dot(seg(pfx + "1_w1"), pat1, preferred_element_type=jnp.float32)
        y1 = jnp.maximum(y1 * s1 + b1, 0.0)                        # (cout, howo)
        skip = jnp.dot(seg(pfx + "1_ws"), x_sub,
                       preferred_element_type=jnp.float32) * ss + bs
        y2 = conv3x3(y1, seg(pfx + "1_w2"), s2, b2)
        x = jnp.maximum(y2 + skip, 0.0)

        # ---- block 2: conv3x3+BN+ReLU -> conv3x3+BN, identity skip ----
        s1, b1, s2, b2 = aff_cols(pfx + "2_aff", 4)
        y1 = jnp.maximum(conv3x3(x, seg(pfx + "2_w1"), s1, b1), 0.0)
        y2 = conv3x3(y1, seg(pfx + "2_w2"), s2, b2)
        return jnp.maximum(y2 + x, 0.0)

    e = branch(pre_e_ref, "e")
    f = branch(pre_f_ref, "d")

    att = jax.nn.sigmoid(e)                                        # EUP
    feat_out_ref[...] = (att * f + f).astype(feat_out_ref.dtype)
    edges_out_ref[...] = e.astype(edges_out_ref.dtype)


# ------------------------------ pallas_call wrapper ----------------------------- #

def edge_attention_module(feat, edges, params):
    """feat, edges: (B, Cin, H, W) NCHW.  Returns (feat_att, edges), each (B, Cout, H/2, W/2)."""
    B, Cin, H, W = feat.shape
    Cout = params["dec"][0]["w1"].shape[0]
    assert H % 2 == 0 and W % 2 == 0
    Ho, Wo = H // 2, W // 2
    HoWo = Ho * Wo
    margin = ((Wo + 1 + 127) // 128) * 128       # >= Wo+1, lane-tile aligned interior

    layout, K = _weight_layout(Cin, Cout)
    wpk = _pack_weights(params, layout, Cin, Cout)                 # (Cout, K), one DMA

    # Column-boundary masks for the in-kernel 3x3 convs (constants, no in-kernel iota work).
    col = np.arange(HoWo) % Wo
    masks = jnp.asarray(np.stack([(col != 0), (col != Wo - 1)]).astype(np.float32))

    # Stride-2 prep (tiny, XLA-side): im2col patches of the first conv at only the Ho*Wo kept
    # positions, plus the stride-2 subsampled input for the projection skip.
    def prep(x):
        xp = jnp.pad(x, ((0, 0), (0, 0), (1, 1), (1, 1)))
        taps = [xp[:, :, ky:ky + H:2, kx:kx + W:2] for ky in range(3) for kx in range(3)]
        pat = jnp.concatenate(taps, axis=1)                        # (B, 9*Cin, Ho, Wo)
        sub = x[:, :, ::2, ::2]                                    # (B, Cin, Ho, Wo)
        return jnp.concatenate([pat, sub], axis=1).reshape(B, 10 * Cin, HoWo).astype(jnp.float32)

    pre_f = prep(feat)
    pre_e = prep(edges)

    kernel = functools.partial(_edge_attention_kernel,
                               cin=Cin, wo=Wo, layout=layout, margin=margin)

    pre_spec = pl.BlockSpec((None, 10 * Cin, HoWo), lambda b: (b, 0, 0))
    out_spec = pl.BlockSpec((None, Cout, HoWo), lambda b: (b, 0, 0))

    flops_branch = 2 * Cout * HoWo * (9 * Cin + Cin + 3 * 9 * Cout)
    cost = pl.CostEstimate(
        flops=2 * B * flops_branch,
        transcendentals=B * Cout * HoWo,
        bytes_accessed=(2 * B * 10 * Cin * HoWo + 2 * B * Cout * HoWo
                        + wpk.size + masks.size) * 4)

    feat_o, edges_o = pl.pallas_call(
        kernel,
        grid=(B,),
        in_specs=[pre_spec, pre_spec,
                  pl.BlockSpec(wpk.shape, lambda b: (0, 0)),
                  pl.BlockSpec(masks.shape, lambda b: (0, 0))],
        out_specs=(out_spec, out_spec),
        out_shape=(jax.ShapeDtypeStruct((B, Cout, HoWo), feat.dtype),
                   jax.ShapeDtypeStruct((B, Cout, HoWo), edges.dtype)),
        scratch_shapes=[pltpu.VMEM((Cout, margin + HoWo + margin), jnp.float32)],
        compiler_params=pltpu.CompilerParams(dimension_semantics=("parallel",)),
        cost_estimate=cost,
    )(pre_f, pre_e, wpk, masks)

    return feat_o.reshape(B, Cout, Ho, Wo), edges_o.reshape(B, Cout, Ho, Wo)


# ------------------------------ pure-JAX reference ------------------------------ #

def _conv_ref(x, w, stride, pad):
    return jax.lax.conv_general_dilated(
        x, w, (stride, stride), [(pad, pad), (pad, pad)],
        dimension_numbers=("NCHW", "OIHW", "NCHW"),
        precision=jax.lax.Precision.HIGHEST)


def _bn_ref(y, s, b):
    return y * s[None, :, None, None] + b[None, :, None, None]


def resnet_block_dec_ref(x, p, subsample):
    stride = 2 if subsample else 1
    h = jnp.maximum(_bn_ref(_conv_ref(x, p["w1"], stride, 1), p["s1"], p["b1"]), 0.0)
    h2 = _bn_ref(_conv_ref(h, p["w2"], 1, 1), p["s2"], p["b2"])
    if "ws" in p:
        skip = _bn_ref(_conv_ref(x, p["ws"], stride, 0), p["ss"], p["bs"])
    else:
        skip = x
    return jnp.maximum(h2 + skip, 0.0)


def edge_attention_module_ref(feat, edges, params):
    f = resnet_block_dec_ref(feat, params["dec"][0], True)
    f = resnet_block_dec_ref(f, params["dec"][1], False)
    e = resnet_block_dec_ref(edges, params["edge"][0], True)
    e = resnet_block_dec_ref(e, params["edge"][1], False)
    att = jax.nn.sigmoid(e)
    return att * f + f, e


# ------------------------------- parameter init --------------------------------- #

def init_block_params(key, cin, cout, subsample):
    k = jax.random.split(key, 9)
    p = {
        "w1": jax.random.normal(k[0], (cout, cin, 3, 3), jnp.float32) / jnp.sqrt(9.0 * cin),
        "s1": 1.0 + 0.1 * jax.random.normal(k[1], (cout,), jnp.float32),
        "b1": 0.1 * jax.random.normal(k[2], (cout,), jnp.float32),
        "w2": jax.random.normal(k[3], (cout, cout, 3, 3), jnp.float32) / jnp.sqrt(9.0 * cout),
        "s2": 1.0 + 0.1 * jax.random.normal(k[4], (cout,), jnp.float32),
        "b2": 0.1 * jax.random.normal(k[5], (cout,), jnp.float32),
    }
    if subsample or cin != cout:
        p["ws"] = jax.random.normal(k[6], (cout, cin, 1, 1), jnp.float32) / jnp.sqrt(1.0 * cin)
        p["ss"] = 1.0 + 0.1 * jax.random.normal(k[7], (cout,), jnp.float32)
        p["bs"] = 0.1 * jax.random.normal(k[8], (cout,), jnp.float32)
    return p


# ------------------------------------- main -------------------------------------- #

if __name__ == "__main__":
    key = jax.random.PRNGKey(0)
    B, Cin, Cout, H, W = 2, 4, 8, 16, 16
    ks = jax.random.split(key, 6)

    # NCHW inputs, matching the PyTorch module.
    feat = jax.random.normal(ks[0], (B, Cin, H, W), jnp.float32)
    edges = jax.random.normal(ks[1], (B, Cin, H, W), jnp.float32)

    params = {
        "dec": [init_block_params(ks[2], Cin, Cout, True),
                init_block_params(ks[3], Cout, Cout, False)],
        "edge": [init_block_params(ks[4], Cin, Cout, True),
                 init_block_params(ks[5], Cout, Cout, False)],
    }

    out_feat, out_edges = jax.jit(edge_attention_module)(feat, edges, params)
    jax.block_until_ready((out_feat, out_edges))

    ref_feat, ref_edges = edge_attention_module_ref(feat, edges, params)
    assert out_feat.shape == (B, Cout, H // 2, W // 2)
    assert out_edges.shape == (B, Cout, H // 2, W // 2)
    assert jnp.allclose(out_feat, ref_feat, atol=1e-3, rtol=1e-3)
    assert jnp.allclose(out_edges, ref_edges, atol=1e-3, rtol=1e-3)

    print("KERNEL_OK")
</pallas_src>

<mosaic_0001>
module attributes {stable_mosaic.version = 11 : i64} {
  func.func @_edge_attention_kernel(%arg0: i32, %arg1: memref<1x40x64xf32, #tpu.memory_space<vmem>>, %arg2: memref<1x40x64xf32, #tpu.memory_space<vmem>>, %arg3: memref<8x532xf32, #tpu.memory_space<vmem>>, %arg4: memref<2x64xf32, #tpu.memory_space<vmem>>, %arg5: memref<1x8x64xf32, #tpu.memory_space<vmem>>, %arg6: memref<1x8x64xf32, #tpu.memory_space<vmem>>, %arg7: memref<8x320xf32, #tpu.memory_space<vmem>>) attributes {dimension_semantics = [#tpu.dimension_semantics<parallel>], iteration_bounds = array<i64: 2>, scalar_prefetch = 0 : i64, scratch_operands = 1 : i64, tpu.core_type = #tpu.core_type<tc>, window_params = [{transform_indices = @transform_0, window_bounds = array<i64: 1, 40, 64>}, {transform_indices = @transform_1, window_bounds = array<i64: 1, 40, 64>}, {pipeline_mode = #tpu.pipeline_mode<synchronous>, transform_indices = @transform_2, window_bounds = array<i64: 8, 532>}, {pipeline_mode = #tpu.pipeline_mode<synchronous>, transform_indices = @transform_3, window_bounds = array<i64: 2, 64>}, {transform_indices = @transform_4, window_bounds = array<i64: 1, 8, 64>}, {transform_indices = @transform_5, window_bounds = array<i64: 1, 8, 64>}]} {
    %c0 = arith.constant 0 : index
    %c0_0 = arith.constant 0 : index
    %0 = vector.load %arg4[%c0, %c0_0] : memref<2x64xf32, #tpu.memory_space<vmem>>, vector<1x64xf32>
    %c1 = arith.constant 1 : index
    %c0_1 = arith.constant 0 : index
    %1 = vector.load %arg4[%c1, %c0_1] : memref<2x64xf32, #tpu.memory_space<vmem>>, vector<1x64xf32>
    %cst = arith.constant 0.000000e+00 : f32
    %2 = vector.broadcast %cst : f32 to vector<8x128xf32>
    %c0_2 = arith.constant 0 : index
    %c0_3 = arith.constant 0 : index
    %3 = vector.load %arg7[%c0_2, %c0_3] : memref<8x320xf32, #tpu.memory_space<vmem>>, vector<8x128xf32>
    tpu.vector_store %arg7[%c0_2, %c0_3], %2 {strides = array<i32>} : memref<8x320xf32, #tpu.memory_space<vmem>>, vector<8x128xf32>,
    %c0_4 = arith.constant 0 : index
    %c192 = arith.constant 192 : index
    %4 = vector.load %arg7[%c0_4, %c192] : memref<8x320xf32, #tpu.memory_space<vmem>>, vector<8x128xf32>
    tpu.vector_store %arg7[%c0_4, %c192], %2 {strides = array<i32>} : memref<8x320xf32, #tpu.memory_space<vmem>>, vector<8x128xf32>,
    %c0_5 = arith.constant 0 : index
    %c0_6 = arith.constant 0 : index
    %c0_7 = arith.constant 0 : index
    %5 = vector.load %arg2[%c0_5, %c0_6, %c0_7] : memref<1x40x64xf32, #tpu.memory_space<vmem>>, vector<1x36x64xf32>
    %6 = vector.shape_cast %5 : vector<1x36x64xf32> to vector<36x64xf32>
    %c0_8 = arith.constant 0 : index
    %c36 = arith.constant 36 : index
    %c0_9 = arith.constant 0 : index
    %7 = vector.load %arg2[%c0_8, %c36, %c0_9] : memref<1x40x64xf32, #tpu.memory_space<vmem>>, vector<1x4x64xf32>
    %8 = vector.shape_cast %7 : vector<1x4x64xf32> to vector<4x64xf32>
    %c0_10 = arith.constant 0 : index
    %c378 = arith.constant 378 : index
    %9 = vector.load %arg3[%c0_10, %c378] : memref<8x532xf32, #tpu.memory_space<vmem>>, vector<8x6xf32>
    %10 = vector.extract_strided_slice %9 {offsets = [0, 0], sizes = [8, 1], strides = [1, 1]} : vector<8x6xf32> to vector<8x1xf32>
    %11 = vector.extract_strided_slice %9 {offsets = [0, 1], sizes = [8, 1], strides = [1, 1]} : vector<8x6xf32> to vector<8x1xf32>
    %12 = vector.extract_strided_slice %9 {offsets = [0, 2], sizes = [8, 1], strides = [1, 1]} : vector<8x6xf32> to vector<8x1xf32>
    %13 = vector.extract_strided_slice %9 {offsets = [0, 3], sizes = [8, 1], strides = [1, 1]} : vector<8x6xf32> to vector<8x1xf32>
    %14 = vector.extract_strided_slice %9 {offsets = [0, 4], sizes = [8, 1], strides = [1, 1]} : vector<8x6xf32> to vector<8x1xf32>
    %15 = vector.extract_strided_slice %9 {offsets = [0, 5], sizes = [8, 1], strides = [1, 1]} : vector<8x6xf32> to vector<8x1xf32>
    %c0_11 = arith.constant 0 : index
    %c266 = arith.constant 266 : index
    %16 = vector.load %arg3[%c0_11, %c266] : memref<8x532xf32, #tpu.memory_space<vmem>>, vector<8x36xf32>
    %cst_12 = arith.constant dense<0.000000e+00> : vector<8x64xf32>
    %17 = tpu.matmul %16, %6, %cst_12 {dimension_numbers = #tpu.dot_dimension_numbers<[1], [0], [0], [1], [0, 0, 1, 1], [], []>} : vector<8x36xf32>, vector<36x64xf32>, vector<8x64xf32> -> vector<8x64xf32>
    %18 = vector.broadcast %10 : vector<8x1xf32> to vector<8x64xf32>
    %19 = arith.mulf %17, %18 : vector<8x64xf32>
    %20 = vector.broadcast %11 : vector<8x1xf32> to vector<8x64xf32>
    %21 = arith.addf %19, %20 : vector<8x64xf32>
    %cst_13 = arith.constant 0.000000e+00 : f32
    %22 = vector.broadcast %cst_13 : f32 to vector<8x64xf32>
    %23 = arith.maximumf %21, %22 : vector<8x64xf32>
    %c0_14 = arith.constant 0 : index
    %c374 = arith.constant 374 : index
    %24 = vector.load %arg3[%c0_14, %c374] : memref<8x532xf32, #tpu.memory_space<vmem>>, vector<8x4xf32>
    %cst_15 = arith.constant dense<0.000000e+00> : vector<8x64xf32>
    %25 = tpu.matmul %24, %8, %cst_15 {dimension_numbers = #tpu.dot_dimension_numbers<[1], [0], [0], [1], [0, 0, 1, 1], [], []>} : vector<8x4xf32>, vector<4x64xf32>, vector<8x64xf32> -> vector<8x64xf32>
    %26 = vector.broadcast %14 : vector<8x1xf32> to vector<8x64xf32>
    %27 = arith.mulf %25, %26 : vector<8x64xf32>
    %28 = vector.broadcast %15 : vector<8x1xf32> to vector<8x64xf32>
    %29 = arith.addf %27, %28 : vector<8x64xf32>
    %c0_16 = arith.constant 0 : index
    %c302 = arith.constant 302 : index
    %30 = vector.load %arg3[%c0_16, %c302] : memref<8x532xf32, #tpu.memory_space<vmem>>, vector<8x72xf32>
    %c0_17 = arith.constant 0 : index
    %c128 = arith.constant 128 : index
    %31 = vector.load %arg7[%c0_17, %c128] : memref<8x320xf32, #tpu.memory_space<vmem>>, vector<8x64xf32>
    tpu.vector_store %arg7[%c0_17, %c128], %23 {strides = array<i32>} : memref<8x320xf32, #tpu.memory_space<vmem>>, vector<8x64xf32>,
    %c0_18 = arith.constant 0 : index
    %c119 = arith.constant 119 : index
    %32 = vector.load %arg7[%c0_18, %c119] : memref<8x320xf32, #tpu.memory_space<vmem>>, vector<8x64xf32>
    %33 = vector.broadcast %0 : vector<1x64xf32> to vector<8x64xf32>
    %34 = arith.mulf %32, %33 : vector<8x64xf32>
    %c0_19 = arith.constant 0 : index
    %c120 = arith.constant 120 : index
    %35 = vector.load %arg7[%c0_19, %c120] : memref<8x320xf32, #tpu.memory_space<vmem>>, vector<8x64xf32>
    %c0_20 = arith.constant 0 : index
    %c121 = arith.constant 121 : index
    %36 = vector.load %arg7[%c0_20, %c121] : memref<8x320xf32, #tpu.memory_space<vmem>>, vector<8x64xf32>
    %37 = vector.broadcast %1 : vector<1x64xf32> to vector<8x64xf32>
    %38 = arith.mulf %36, %37 : vector<8x64xf32>
    %c0_21 = arith.constant 0 : index
    %c127 = arith.constant 127 : index
    %39 = vector.load %arg7[%c0_21, %c127] : memref<8x320xf32, #tpu.memory_space<vmem>>, vector<8x64xf32>
    %40 = vector.broadcast %0 : vector<1x64xf32> to vector<8x64xf32>
    %41 = arith.mulf %39, %40 : vector<8x64xf32>
    %c0_22 = arith.constant 0 : index
    %c128_23 = arith.constant 128 : index
    %42 = vector.load %arg7[%c0_22, %c128_23] : memref<8x320xf32, #tpu.memory_space<vmem>>, vector<8x64xf32>
    %c0_24 = arith.constant 0 : index
    %c129 = arith.constant 129 : index
    %43 = vector.load %arg7[%c0_24, %c129] : memref<8x320xf32, #tpu.memory_space<vmem>>, vector<8x64xf32>
    %44 = vector.broadcast %1 : vector<1x64xf32> to vector<8x64xf32>
    %45 = arith.mulf %43, %44 : vector<8x64xf32>
    %c0_25 = arith.constant 0 : index
    %c135 = arith.constant 135 : index
    %46 = vector.load %arg7[%c0_25, %c135] : memref<8x320xf32, #tpu.memory_space<vmem>>, vector<8x64xf32>
    %47 = vector.broadcast %0 : vector<1x64xf32> to vector<8x64xf32>
    %48 = arith.mulf %46, %47 : vector<8x64xf32>
    %c0_26 = arith.constant 0 : index
    %c136 = arith.constant 136 : index
    %49 = vector.load %arg7[%c0_26, %c136] : memref<8x320xf32, #tpu.memory_space<vmem>>, vector<8x64xf32>
    %c0_27 = arith.constant 0 : index
    %c137 = arith.constant 137 : index
    %50 = vector.load %arg7[%c0_27, %c137] : memref<8x320xf32, #tpu.memory_space<vmem>>, vector<8x64xf32>
    %51 = vector.broadcast %1 : vector<1x64xf32> to vector<8x64xf32>
    %52 = arith.mulf %50, %51 : vector<8x64xf32>
    %53 = tpu.concatenate %34, %35, %38, %41, %42, %45, %48, %49, %52 in 0 : vector<8x64xf32>, vector<8x64xf32>, vector<8x64xf32>, vector<8x64xf32>, vector<8x64xf32>, vector<8x64xf32>, vector<8x64xf32>, vector<8x64xf32>, vector<8x64xf32> -> vector<72x64xf32>
    %cst_28 = arith.constant dense<0.000000e+00> : vector<8x64xf32>
    %54 = tpu.matmul %30, %53, %cst_28 {dimension_numbers = #tpu.dot_dimension_numbers<[1], [0], [0], [1], [0, 0, 1, 1], [], []>} : vector<8x72xf32>, vector<72x64xf32>, vector<8x64xf32> -> vector<8x64xf32>
    %55 = vector.broadcast %12 : vector<8x1xf32> to vector<8x64xf32>
    %56 = arith.mulf %54, %55 : vector<8x64xf32>
    %57 = vector.broadcast %13 : vector<8x1xf32> to vector<8x64xf32>
    %58 = arith.addf %56, %57 : vector<8x64xf32>
    %59 = arith.addf %58, %29 : vector<8x64xf32>
    %cst_29 = arith.constant 0.000000e+00 : f32
    %60 = vector.broadcast %cst_29 : f32 to vector<8x64xf32>
    %61 = arith.maximumf %59, %60 : vector<8x64xf32>
    %c0_30 = arith.constant 0 : index
    %c528 = arith.constant 528 : index
    %62 = vector.load %arg3[%c0_30, %c528] : memref<8x532xf32, #tpu.memory_space<vmem>>, vector<8x4xf32>
    %63 = vector.extract_strided_slice %62 {offsets = [0, 0], sizes = [8, 1], strides = [1, 1]} : vector<8x4xf32> to vector<8x1xf32>
    %64 = vector.extract_strided_slice %62 {offsets = [0, 1], sizes = [8, 1], strides = [1, 1]} : vector<8x4xf32> to vector<8x1xf32>
    %65 = vector.extract_strided_slice %62 {offsets = [0, 2], sizes = [8, 1], strides = [1, 1]} : vector<8x4xf32> to vector<8x1xf32>
    %66 = vector.extract_strided_slice %62 {offsets = [0, 3], sizes = [8, 1], strides = [1, 1]} : vector<8x4xf32> to vector<8x1xf32>
    %c0_31 = arith.constant 0 : index
    %c384 = arith.constant 384 : index
    %67 = vector.load %arg3[%c0_31, %c384] : memref<8x532xf32, #tpu.memory_space<vmem>>, vector<8x72xf32>
    %c0_32 = arith.constant 0 : index
    %c128_33 = arith.constant 128 : index
    %68 = vector.load %arg7[%c0_32, %c128_33] : memref<8x320xf32, #tpu.memory_space<vmem>>, vector<8x64xf32>
    tpu.vector_store %arg7[%c0_32, %c128_33], %61 {strides = array<i32>} : memref<8x320xf32, #tpu.memory_space<vmem>>, vector<8x64xf32>,
    %c0_34 = arith.constant 0 : index
    %c119_35 = arith.constant 119 : index
    %69 = vector.load %arg7[%c0_34, %c119_35] : memref<8x320xf32, #tpu.memory_space<vmem>>, vector<8x64xf32>
    %70 = vector.broadcast %0 : vector<1x64xf32> to vector<8x64xf32>
    %71 = arith.mulf %69, %70 : vector<8x64xf32>
    %c0_36 = arith.constant 0 : index
    %c120_37 = arith.constant 120 : index
    %72 = vector.load %arg7[%c0_36, %c120_37] : memref<8x320xf32, #tpu.memory_space<vmem>>, vector<8x64xf32>
    %c0_38 = arith.constant 0 : index
    %c121_39 = arith.constant 121 : index
    %73 = vector.load %arg7[%c0_38, %c121_39] : memref<8x320xf32, #tpu.memory_space<vmem>>, vector<8x64xf32>
    %74 = vector.broadcast %1 : vector<1x64xf32> to vector<8x64xf32>
    %75 = arith.mulf %73, %74 : vector<8x64xf32>
    %c0_40 = arith.constant 0 : index
    %c127_41 = arith.constant 127 : index
    %76 = vector.load %arg7[%c0_40, %c127_41] : memref<8x320xf32, #tpu.memory_space<vmem>>, vector<8x64xf32>
    %77 = vector.broadcast %0 : vector<1x64xf32> to vector<8x64xf32>
    %78 = arith.mulf %76, %77 : vector<8x64xf32>
    %c0_42 = arith.constant 0 : index
    %c128_43 = arith.constant 128 : index
    %79 = vector.load %arg7[%c0_42, %c128_43] : memref<8x320xf32, #tpu.memory_space<vmem>>, vector<8x64xf32>
    %c0_44 = arith.constant 0 : index
    %c129_45 = arith.constant 129 : index
    %80 = vector.load %arg7[%c0_44, %c129_45] : memref<8x320xf32, #tpu.memory_space<vmem>>, vector<8x64xf32>
    %81 = vector.broadcast %1 : vector<1x64xf32> to vector<8x64xf32>
    %82 = arith.mulf %80, %81 : vector<8x64xf32>
    %c0_46 = arith.constant 0 : index
    %c135_47 = arith.constant 135 : index
    %83 = vector.load %arg7[%c0_46, %c135_47] : memref<8x320xf32, #tpu.memory_space<vmem>>, vector<8x64xf32>
    %84 = vector.broadcast %0 : vector<1x64xf32> to vector<8x64xf32>
    %85 = arith.mulf %83, %84 : vector<8x64xf32>
    %c0_48 = arith.constant 0 : index
    %c136_49 = arith.constant 136 : index
    %86 = vector.load %arg7[%c0_48, %c136_49] : memref<8x320xf32, #tpu.memory_space<vmem>>, vector<8x64xf32>
    %c0_50 = arith.constant 0 : index
    %c137_51 = arith.constant 137 : index
    %87 = vector.load %arg7[%c0_50, %c137_51] : memref<8x320xf32, #tpu.memory_space<vmem>>, vector<8x64xf32>
    %88 = vector.broadcast %1 : vector<1x64xf32> to vector<8x64xf32>
    %89 = arith.mulf %87, %88 : vector<8x64xf32>
    %90 = tpu.concatenate %71, %72, %75, %78, %79, %82, %85, %86, %89 in 0 : vector<8x64xf32>, vector<8x64xf32>, vector<8x64xf32>, vector<8x64xf32>, vector<8x64xf32>, vector<8x64xf32>, vector<8x64xf32>, vector<8x64xf32>, vector<8x64xf32> -> vector<72x64xf32>
    %cst_52 = arith.constant dense<0.000000e+00> : vector<8x64xf32>
    %91 = tpu.matmul %67, %90, %cst_52 {dimension_numbers = #tpu.dot_dimension_numbers<[1], [0], [0], [1], [0, 0, 1, 1], [], []>} : vector<8x72xf32>, vector<72x64xf32>, vector<8x64xf32> -> vector<8x64xf32>
    %92 = vector.broadcast %63 : vector<8x1xf32> to vector<8x64xf32>
    %93 = arith.mulf %91, %92 : vector<8x64xf32>
    %94 = vector.broadcast %64 : vector<8x1xf32> to vector<8x64xf32>
    %95 = arith.addf %93, %94 : vector<8x64xf32>
    %cst_53 = arith.constant 0.000000e+00 : f32
    %96 = vector.broadcast %cst_53 : f32 to vector<8x64xf32>
    %97 = arith.maximumf %95, %96 : vector<8x64xf32>
    %c0_54 = arith.constant 0 : index
    %c456 = arith.constant 456 : index
    %98 = vector.load %arg3[%c0_54, %c456] : memref<8x532xf32, #tpu.memory_space<vmem>>, vector<8x72xf32>
    %c0_55 = arith.constant 0 : index
    %c128_56 = arith.constant 128 : index
    %99 = vector.load %arg7[%c0_55, %c128_56] : memref<8x320xf32, #tpu.memory_space<vmem>>, vector<8x64xf32>
    tpu.vector_store %arg7[%c0_55, %c128_56], %97 {strides = array<i32>} : memref<8x320xf32, #tpu.memory_space<vmem>>, vector<8x64xf32>,
    %c0_57 = arith.constant 0 : index
    %c119_58 = arith.constant 119 : index
    %100 = vector.load %arg7[%c0_57, %c119_58] : memref<8x320xf32, #tpu.memory_space<vmem>>, vector<8x64xf32>
    %101 = vector.broadcast %0 : vector<1x64xf32> to vector<8x64xf32>
    %102 = arith.mulf %100, %101 : vector<8x64xf32>
    %c0_59 = arith.constant 0 : index
    %c120_60 = arith.constant 120 : index
    %103 = vector.load %arg7[%c0_59, %c120_60] : memref<8x320xf32, #tpu.memory_space<vmem>>, vector<8x64xf32>
    %c0_61 = arith.constant 0 : index
    %c121_62 = arith.constant 121 : index
    %104 = vector.load %arg7[%c0_61, %c121_62] : memref<8x320xf32, #tpu.memory_space<vmem>>, vector<8x64xf32>
    %105 = vector.broadcast %1 : vector<1x64xf32> to vector<8x64xf32>
    %106 = arith.mulf %104, %105 : vector<8x64xf32>
    %c0_63 = arith.constant 0 : index
    %c127_64 = arith.constant 127 : index
    %107 = vector.load %arg7[%c0_63, %c127_64] : memref<8x320xf32, #tpu.memory_space<vmem>>, vector<8x64xf32>
    %108 = vector.broadcast %0 : vector<1x64xf32> to vector<8x64xf32>
    %109 = arith.mulf %107, %108 : vector<8x64xf32>
    %c0_65 = arith.constant 0 : index
    %c128_66 = arith.constant 128 : index
    %110 = vector.load %arg7[%c0_65, %c128_66] : memref<8x320xf32, #tpu.memory_space<vmem>>, vector<8x64xf32>
    %c0_67 = arith.constant 0 : index
    %c129_68 = arith.constant 129 : index
    %111 = vector.load %arg7[%c0_67, %c129_68] : memref<8x320xf32, #tpu.memory_space<vmem>>, vector<8x64xf32>
    %112 = vector.broadcast %1 : vector<1x64xf32> to vector<8x64xf32>
    %113 = arith.mulf %111, %112 : vector<8x64xf32>
    %c0_69 = arith.constant 0 : index
    %c135_70 = arith.constant 135 : index
    %114 = vector.load %arg7[%c0_69, %c135_70] : memref<8x320xf32, #tpu.memory_space<vmem>>, vector<8x64xf32>
    %115 = vector.broadcast %0 : vector<1x64xf32> to vector<8x64xf32>
    %116 = arith.mulf %114, %115 : vector<8x64xf32>
    %c0_71 = arith.constant 0 : index
    %c136_72 = arith.constant 136 : index
    %117 = vector.load %arg7[%c0_71, %c136_72] : memref<8x320xf32, #tpu.memory_space<vmem>>, vector<8x64xf32>
    %c0_73 = arith.constant 0 : index
    %c137_74 = arith.constant 137 : index
    %118 = vector.load %arg7[%c0_73, %c137_74] : memref<8x320xf32, #tpu.memory_space<vmem>>, vector<8x64xf32>
    %119 = vector.broadcast %1 : vector<1x64xf32> to vector<8x64xf32>
    %120 = arith.mulf %118, %119 : vector<8x64xf32>
    %121 = tpu.concatenate %102, %103, %106, %109, %110, %113, %116, %117, %120 in 0 : vector<8x64xf32>, vector<8x64xf32>, vector<8x64xf32>, vector<8x64xf32>, vector<8x64xf32>, vector<8x64xf32>, vector<8x64xf32>, vector<8x64xf32>, vector<8x64xf32> -> vector<72x64xf32>
    %cst_75 = arith.constant dense<0.000000e+00> : vector<8x64xf32>
    %122 = tpu.matmul %98, %121, %cst_75 {dimension_numbers = #tpu.dot_dimension_numbers<[1], [0], [0], [1], [0, 0, 1, 1], [], []>} : vector<8x72xf32>, vector<72x64xf32>, vector<8x64xf32> -> vector<8x64xf32>
    %123 = vector.broadcast %65 : vector<8x1xf32> to vector<8x64xf32>
    %124 = arith.mulf %122, %123 : vector<8x64xf32>
    %125 = vector.broadcast %66 : vector<8x1xf32> to vector<8x64xf32>
    %126 = arith.addf %124, %125 : vector<8x64xf32>
    %127 = arith.addf %126, %61 : vector<8x64xf32>
    %cst_76 = arith.constant 0.000000e+00 : f32
    %128 = vector.broadcast %cst_76 : f32 to vector<8x64xf32>
    %129 = arith.maximumf %127, %128 : vector<8x64xf32>
    %c0_77 = arith.constant 0 : index
    %c0_78 = arith.constant 0 : index
    %c0_79 = arith.constant 0 : index
    %130 = vector.load %arg1[%c0_77, %c0_78, %c0_79] : memref<1x40x64xf32, #tpu.memory_space<vmem>>, vector<1x36x64xf32>
    %131 = vector.shape_cast %130 : vector<1x36x64xf32> to vector<36x64xf32>
    %c0_80 = arith.constant 0 : index
    %c36_81 = arith.constant 36 : index
    %c0_82 = arith.constant 0 : index
    %132 = vector.load %arg1[%c0_80, %c36_81, %c0_82] : memref<1x40x64xf32, #tpu.memory_space<vmem>>, vector<1x4x64xf32>
    %133 = vector.shape_cast %132 : vector<1x4x64xf32> to vector<4x64xf32>
    %c0_83 = arith.constant 0 : index
    %c112 = arith.constant 112 : index
    %134 = vector.load %arg3[%c0_83, %c112] : memref<8x532xf32, #tpu.memory_space<vmem>>, vector<8x6xf32>
    %135 = vector.extract_strided_slice %134 {offsets = [0, 0], sizes = [8, 1], strides = [1, 1]} : vector<8x6xf32> to vector<8x1xf32>
    %136 = vector.extract_strided_slice %134 {offsets = [0, 1], sizes = [8, 1], strides = [1, 1]} : vector<8x6xf32> to vector<8x1xf32>
    %137 = vector.extract_strided_slice %134 {offsets = [0, 2], sizes = [8, 1], strides = [1, 1]} : vector<8x6xf32> to vector<8x1xf32>
    %138 = vector.extract_strided_slice %134 {offsets = [0, 3], sizes = [8, 1], strides = [1, 1]} : vector<8x6xf32> to vector<8x1xf32>
    %139 = vector.extract_strided_slice %134 {offsets = [0, 4], sizes = [8, 1], strides = [1, 1]} : vector<8x6xf32> to vector<8x1xf32>
    %140 = vector.extract_strided_slice %134 {offsets = [0, 5], sizes = [8, 1], strides = [1, 1]} : vector<8x6xf32> to vector<8x1xf32>
    %c0_84 = arith.constant 0 : index
    %c0_85 = arith.constant 0 : index
    %141 = vector.load %arg3[%c0_84, %c0_85] : memref<8x532xf32, #tpu.memory_space<vmem>>, vector<8x36xf32>
    %cst_86 = arith.constant dense<0.000000e+00> : vector<8x64xf32>
    %142 = tpu.matmul %141, %131, %cst_86 {dimension_numbers = #tpu.dot_dimension_numbers<[1], [0], [0], [1], [0, 0, 1, 1], [], []>} : vector<8x36xf32>, vector<36x64xf32>, vector<8x64xf32> -> vector<8x64xf32>
    %143 = vector.broadcast %135 : vector<8x1xf32> to vector<8x64xf32>
    %144 = arith.mulf %142, %143 : vector<8x64xf32>
    %145 = vector.broadcast %136 : vector<8x1xf32> to vector<8x64xf32>
    %146 = arith.addf %144, %145 : vector<8x64xf32>
    %cst_87 = arith.constant 0.000000e+00 : f32
    %147 = vector.broadcast %cst_87 : f32 to vector<8x64xf32>
    %148 = arith.maximumf %146, %147 : vector<8x64xf32>
    %c0_88 = arith.constant 0 : index
    %c108 = arith.constant 108 : index
    %149 = vector.load %arg3[%c0_88, %c108] : memref<8x532xf32, #tpu.memory_space<vmem>>, vector<8x4xf32>
    %cst_89 = arith.constant dense<0.000000e+00> : vector<8x64xf32>
    %150 = tpu.matmul %149, %133, %cst_89 {dimension_numbers = #tpu.dot_dimension_numbers<[1], [0], [0], [1], [0, 0, 1, 1], [], []>} : vector<8x4xf32>, vector<4x64xf32>, vector<8x64xf32> -> vector<8x64xf32>
    %151 = vector.broadcast %139 : vector<8x1xf32> to vector<8x64xf32>
    %152 = arith.mulf %150, %151 : vector<8x64xf32>
    %153 = vector.broadcast %140 : vector<8x1xf32> to vector<8x64xf32>
    %154 = arith.addf %152, %153 : vector<8x64xf32>
    %c0_90 = arith.constant 0 : index
    %c36_91 = arith.constant 36 : index
    %155 = vector.load %arg3[%c0_90, %c36_91] : memref<8x532xf32, #tpu.memory_space<vmem>>, vector<8x72xf32>
    %c0_92 = arith.constant 0 : index
    %c128_93 = arith.constant 128 : index
    %156 = vector.load %arg7[%c0_92, %c128_93] : memref<8x320xf32, #tpu.memory_space<vmem>>, vector<8x64xf32>
    tpu.vector_store %arg7[%c0_92, %c128_93], %148 {strides = array<i32>} : memref<8x320xf32, #tpu.memory_space<vmem>>, vector<8x64xf32>,
    %c0_94 = arith.constant 0 : index
    %c119_95 = arith.constant 119 : index
    %157 = vector.load %arg7[%c0_94, %c119_95] : memref<8x320xf32, #tpu.memory_space<vmem>>, vector<8x64xf32>
    %158 = vector.broadcast %0 : vector<1x64xf32> to vector<8x64xf32>
    %159 = arith.mulf %157, %158 : vector<8x64xf32>
    %c0_96 = arith.constant 0 : index
    %c120_97 = arith.constant 120 : index
    %160 = vector.load %arg7[%c0_96, %c120_97] : memref<8x320xf32, #tpu.memory_space<vmem>>, vector<8x64xf32>
    %c0_98 = arith.constant 0 : index
    %c121_99 = arith.constant 121 : index
    %161 = vector.load %arg7[%c0_98, %c121_99] : memref<8x320xf32, #tpu.memory_space<vmem>>, vector<8x64xf32>
    %162 = vector.broadcast %1 : vector<1x64xf32> to vector<8x64xf32>
    %163 = arith.mulf %161, %162 : vector<8x64xf32>
    %c0_100 = arith.constant 0 : index
    %c127_101 = arith.constant 127 : index
    %164 = vector.load %arg7[%c0_100, %c127_101] : memref<8x320xf32, #tpu.memory_space<vmem>>, vector<8x64xf32>
    %165 = vector.broadcast %0 : vector<1x64xf32> to vector<8x64xf32>
    %166 = arith.mulf %164, %165 : vector<8x64xf32>
    %c0_102 = arith.constant 0 : index
    %c128_103 = arith.constant 128 : index
    %167 = vector.load %arg7[%c0_102, %c128_103] : memref<8x320xf32, #tpu.memory_space<vmem>>, vector<8x64xf32>
    %c0_104 = arith.constant 0 : index
    %c129_105 = arith.constant 129 : index
    %168 = vector.load %arg7[%c0_104, %c129_105] : memref<8x320xf32, #tpu.memory_space<vmem>>, vector<8x64xf32>
    %169 = vector.broadcast %1 : vector<1x64xf32> to vector<8x64xf32>
    %170 = arith.mulf %168, %169 : vector<8x64xf32>
    %c0_106 = arith.constant 0 : index
    %c135_107 = arith.constant 135 : index
    %171 = vector.load %arg7[%c0_106, %c135_107] : memref<8x320xf32, #tpu.memory_space<vmem>>, vector<8x64xf32>
    %172 = vector.broadcast %0 : vector<1x64xf32> to vector<8x64xf32>
    %173 = arith.mulf %171, %172 : vector<8x64xf32>
    %c0_108 = arith.constant 0 : index
    %c136_109 = arith.constant 136 : index
    %174 = vector.load %arg7[%c0_108, %c136_109] : memref<8x320xf32, #tpu.memory_space<vmem>>, vector<8x64xf32>
    %c0_110 = arith.constant 0 : index
    %c137_111 = arith.constant 137 : index
    %175 = vector.load %arg7[%c0_110, %c137_111] : memref<8x320xf32, #tpu.memory_space<vmem>>, vector<8x64xf32>
    %176 = vector.broadcast %1 : vector<1x64xf32> to vector<8x64xf32>
    %177 = arith.mulf %175, %176 : vector<8x64xf32>
    %178 = tpu.concatenate %159, %160, %163, %166, %167, %170, %173, %174, %177 in 0 : vector<8x64xf32>, vector<8x64xf32>, vector<8x64xf32>, vector<8x64xf32>, vector<8x64xf32>, vector<8x64xf32>, vector<8x64xf32>, vector<8x64xf32>, vector<8x64xf32> -> vector<72x64xf32>
    %cst_112 = arith.constant dense<0.000000e+00> : vector<8x64xf32>
    %179 = tpu.matmul %155, %178, %cst_112 {dimension_numbers = #tpu.dot_dimension_numbers<[1], [0], [0], [1], [0, 0, 1, 1], [], []>} : vector<8x72xf32>, vector<72x64xf32>, vector<8x64xf32> -> vector<8x64xf32>
    %180 = vector.broadcast %137 : vector<8x1xf32> to vector<8x64xf32>
    %181 = arith.mulf %179, %180 : vector<8x64xf32>
    %182 = vector.broadcast %138 : vector<8x1xf32> to vector<8x64xf32>
    %183 = arith.addf %181, %182 : vector<8x64xf32>
    %184 = arith.addf %183, %154 : vector<8x64xf32>
    %cst_113 = arith.constant 0.000000e+00 : f32
    %185 = vector.broadcast %cst_113 : f32 to vector<8x64xf32>
    %186 = arith.maximumf %184, %185 : vector<8x64xf32>
    %c0_114 = arith.constant 0 : index
    %c262 = arith.constant 262 : index
    %187 = vector.load %arg3[%c0_114, %c262] : memref<8x532xf32, #tpu.memory_space<vmem>>, vector<8x4xf32>
    %188 = vector.extract_strided_slice %187 {offsets = [0, 0], sizes = [8, 1], strides = [1, 1]} : vector<8x4xf32> to vector<8x1xf32>
    %189 = vector.extract_strided_slice %187 {offsets = [0, 1], sizes = [8, 1], strides = [1, 1]} : vector<8x4xf32> to vector<8x1xf32>
    %190 = vector.extract_strided_slice %187 {offsets = [0, 2], sizes = [8, 1], strides = [1, 1]} : vector<8x4xf32> to vector<8x1xf32>
    %191 = vector.extract_strided_slice %187 {offsets = [0, 3], sizes = [8, 1], strides = [1, 1]} : vector<8x4xf32> to vector<8x1xf32>
    %c0_115 = arith.constant 0 : index
    %c118 = arith.constant 118 : index
    %192 = vector.load %arg3[%c0_115, %c118] : memref<8x532xf32, #tpu.memory_space<vmem>>, vector<8x72xf32>
    %c0_116 = arith.constant 0 : index
    %c128_117 = arith.constant 128 : index
    %193 = vector.load %arg7[%c0_116, %c128_117] : memref<8x320xf32, #tpu.memory_space<vmem>>, vector<8x64xf32>
    tpu.vector_store %arg7[%c0_116, %c128_117], %186 {strides = array<i32>} : memref<8x320xf32, #tpu.memory_space<vmem>>, vector<8x64xf32>,
    %c0_118 = arith.constant 0 : index
    %c119_119 = arith.constant 119 : index
    %194 = vector.load %arg7[%c0_118, %c119_119] : memref<8x320xf32, #tpu.memory_space<vmem>>, vector<8x64xf32>
    %195 = vector.broadcast %0 : vector<1x64xf32> to vector<8x64xf32>
    %196 = arith.mulf %194, %195 : vector<8x64xf32>
    %c0_120 = arith.constant 0 : index
    %c120_121 = arith.constant 120 : index
    %197 = vector.load %arg7[%c0_120, %c120_121] : memref<8x320xf32, #tpu.memory_space<vmem>>, vector<8x64xf32>
    %c0_122 = arith.constant 0 : index
    %c121_123 = arith.constant 121 : index
    %198 = vector.load %arg7[%c0_122, %c121_123] : memref<8x320xf32, #tpu.memory_space<vmem>>, vector<8x64xf32>
    %199 = vector.broadcast %1 : vector<1x64xf32> to vector<8x64xf32>
    %200 = arith.mulf %198, %199 : vector<8x64xf32>
    %c0_124 = arith.constant 0 : index
    %c127_125 = arith.constant 127 : index
    %201 = vector.load %arg7[%c0_124, %c127_125] : memref<8x320xf32, #tpu.memory_space<vmem>>, vector<8x64xf32>
    %202 = vector.broadcast %0 : vector<1x64xf32> to vector<8x64xf32>
    %203 = arith.mulf %201, %202 : vector<8x64xf32>
    %c0_126 = arith.constant 0 : index
    %c128_127 = arith.constant 128 : index
    %204 = vector.load %arg7[%c0_126, %c128_127] : memref<8x320xf32, #tpu.memory_space<vmem>>, vector<8x64xf32>
    %c0_128 = arith.constant 0 : index
    %c129_129 = arith.constant 129 : index
    %205 = vector.load %arg7[%c0_128, %c129_129] : memref<8x320xf32, #tpu.memory_space<vmem>>, vector<8x64xf32>
    %206 = vector.broadcast %1 : vector<1x64xf32> to vector<8x64xf32>
    %207 = arith.mulf %205, %206 : vector<8x64xf32>
    %c0_130 = arith.constant 0 : index
    %c135_131 = arith.constant 135 : index
    %208 = vector.load %arg7[%c0_130, %c135_131] : memref<8x320xf32, #tpu.memory_space<vmem>>, vector<8x64xf32>
    %209 = vector.broadcast %0 : vector<1x64xf32> to vector<8x64xf32>
    %210 = arith.mulf %208, %209 : vector<8x64xf32>
    %c0_132 = arith.constant 0 : index
    %c136_133 = arith.constant 136 : index
    %211 = vector.load %arg7[%c0_132, %c136_133] : memref<8x320xf32, #tpu.memory_space<vmem>>, vector<8x64xf32>
    %c0_134 = arith.constant 0 : index
    %c137_135 = arith.constant 137 : index
    %212 = vector.load %arg7[%c0_134, %c137_135] : memref<8x320xf32, #tpu.memory_space<vmem>>, vector<8x64xf32>
    %213 = vector.broadcast %1 : vector<1x64xf32> to vector<8x64xf32>
    %214 = arith.mulf %212, %213 : vector<8x64xf32>
    %215 = tpu.concatenate %196, %197, %200, %203, %204, %207, %210, %211, %214 in 0 : vector<8x64xf32>, vector<8x64xf32>, vector<8x64xf32>, vector<8x64xf32>, vector<8x64xf32>, vector<8x64xf32>, vector<8x64xf32>, vector<8x64xf32>, vector<8x64xf32> -> vector<72x64xf32>
    %cst_136 = arith.constant dense<0.000000e+00> : vector<8x64xf32>
    %216 = tpu.matmul %192, %215, %cst_136 {dimension_numbers = #tpu.dot_dimension_numbers<[1], [0], [0], [1], [0, 0, 1, 1], [], []>} : vector<8x72xf32>, vector<72x64xf32>, vector<8x64xf32> -> vector<8x64xf32>
    %217 = vector.broadcast %188 : vector<8x1xf32> to vector<8x64xf32>
    %218 = arith.mulf %216, %217 : vector<8x64xf32>
    %219 = vector.broadcast %189 : vector<8x1xf32> to vector<8x64xf32>
    %220 = arith.addf %218, %219 : vector<8x64xf32>
    %cst_137 = arith.constant 0.000000e+00 : f32
    %221 = vector.broadcast %cst_137 : f32 to vector<8x64xf32>
    %222 = arith.maximumf %220, %221 : vector<8x64xf32>
    %c0_138 = arith.constant 0 : index
    %c190 = arith.constant 190 : index
    %223 = vector.load %arg3[%c0_138, %c190] : memref<8x532xf32, #tpu.memory_space<vmem>>, vector<8x72xf32>
    %c0_139 = arith.constant 0 : index
    %c128_140 = arith.constant 128 : index
    %224 = vector.load %arg7[%c0_139, %c128_140] : memref<8x320xf32, #tpu.memory_space<vmem>>, vector<8x64xf32>
    tpu.vector_store %arg7[%c0_139, %c128_140], %222 {strides = array<i32>} : memref<8x320xf32, #tpu.memory_space<vmem>>, vector<8x64xf32>,
    %c0_141 = arith.constant 0 : index
    %c119_142 = arith.constant 119 : index
    %225 = vector.load %arg7[%c0_141, %c119_142] : memref<8x320xf32, #tpu.memory_space<vmem>>, vector<8x64xf32>
    %226 = vector.broadcast %0 : vector<1x64xf32> to vector<8x64xf32>
    %227 = arith.mulf %225, %226 : vector<8x64xf32>
    %c0_143 = arith.constant 0 : index
    %c120_144 = arith.constant 120 : index
    %228 = vector.load %arg7[%c0_143, %c120_144] : memref<8x320xf32, #tpu.memory_space<vmem>>, vector<8x64xf32>
    %c0_145 = arith.constant 0 : index
    %c121_146 = arith.constant 121 : index
    %229 = vector.load %arg7[%c0_145, %c121_146] : memref<8x320xf32, #tpu.memory_space<vmem>>, vector<8x64xf32>
    %230 = vector.broadcast %1 : vector<1x64xf32> to vector<8x64xf32>
    %231 = arith.mulf %229, %230 : vector<8x64xf32>
    %c0_147 = arith.constant 0 : index
    %c127_148 = arith.constant 127 : index
    %232 = vector.load %arg7[%c0_147, %c127_148] : memref<8x320xf32, #tpu.memory_space<vmem>>, vector<8x64xf32>
    %233 = vector.broadcast %0 : vector<1x64xf32> to vector<8x64xf32>
    %234 = arith.mulf %232, %233 : vector<8x64xf32>
    %c0_149 = arith.constant 0 : index
    %c128_150 = arith.constant 128 : index
    %235 = vector.load %arg7[%c0_149, %c128_150] : memref<8x320xf32, #tpu.memory_space<vmem>>, vector<8x64xf32>
    %c0_151 = arith.constant 0 : index
    %c129_152 = arith.constant 129 : index
    %236 = vector.load %arg7[%c0_151, %c129_152] : memref<8x320xf32, #tpu.memory_space<vmem>>, vector<8x64xf32>
    %237 = vector.broadcast %1 : vector<1x64xf32> to vector<8x64xf32>
    %238 = arith.mulf %236, %237 : vector<8x64xf32>
    %c0_153 = arith.constant 0 : index
    %c135_154 = arith.constant 135 : index
    %239 = vector.load %arg7[%c0_153, %c135_154] : memref<8x320xf32, #tpu.memory_space<vmem>>, vector<8x64xf32>
    %240 = vector.broadcast %0 : vector<1x64xf32> to vector<8x64xf32>
    %241 = arith.mulf %239, %240 : vector<8x64xf32>
    %c0_155 = arith.constant 0 : index
    %c136_156 = arith.constant 136 : index
    %242 = vector.load %arg7[%c0_155, %c136_156] : memref<8x320xf32, #tpu.memory_space<vmem>>, vector<8x64xf32>
    %c0_157 = arith.constant 0 : index
    %c137_158 = arith.constant 137 : index
    %243 = vector.load %arg7[%c0_157, %c137_158] : memref<8x320xf32, #tpu.memory_space<vmem>>, vector<8x64xf32>
    %244 = vector.broadcast %1 : vector<1x64xf32> to vector<8x64xf32>
    %245 = arith.mulf %243, %244 : vector<8x64xf32>
    %246 = tpu.concatenate %227, %228, %231, %234, %235, %238, %241, %242, %245 in 0 : vector<8x64xf32>, vector<8x64xf32>, vector<8x64xf32>, vector<8x64xf32>, vector<8x64xf32>, vector<8x64xf32>, vector<8x64xf32>, vector<8x64xf32>, vector<8x64xf32> -> vector<72x64xf32>
    %cst_159 = arith.constant dense<0.000000e+00> : vector<8x64xf32>
    %247 = tpu.matmul %223, %246, %cst_159 {dimension_numbers = #tpu.dot_dimension_numbers<[1], [0], [0], [1], [0, 0, 1, 1], [], []>} : vector<8x72xf32>, vector<72x64xf32>, vector<8x64xf32> -> vector<8x64xf32>
    %248 = vector.broadcast %190 : vector<8x1xf32> to vector<8x64xf32>
    %249 = arith.mulf %247, %248 : vector<8x64xf32>
    %250 = vector.broadcast %191 : vector<8x1xf32> to vector<8x64xf32>
    %251 = arith.addf %249, %250 : vector<8x64xf32>
    %252 = arith.addf %251, %186 : vector<8x64xf32>
    %cst_160 = arith.constant 0.000000e+00 : f32
    %253 = vector.broadcast %cst_160 : f32 to vector<8x64xf32>
    %254 = arith.maximumf %252, %253 : vector<8x64xf32>
    %255 = arith.negf %129 : vector<8x64xf32>
    %256 = math.exp %255 : vector<8x64xf32>
    %cst_161 = arith.constant 1.000000e+00 : f32
    %257 = vector.broadcast %cst_161 : f32 to vector<8x64xf32>
    %258 = arith.addf %257, %256 : vector<8x64xf32>
    %259 = arith.divf %257, %258 : vector<8x64xf32>
    %260 = arith.mulf %259, %254 : vector<8x64xf32>
    %261 = arith.addf %260, %254 : vector<8x64xf32>
    %c0_162 = arith.constant 0 : index
    %c0_163 = arith.constant 0 : index
    %c0_164 = arith.constant 0 : index
    %262 = vector.load %arg5[%c0_162, %c0_163, %c0_164] : memref<1x8x64xf32, #tpu.memory_space<vmem>>, vector<1x8x64xf32>
    %263 = vector.shape_cast %262 : vector<1x8x64xf32> to vector<8x64xf32>
    %264 = vector.shape_cast %261 : vector<8x64xf32> to vector<1x8x64xf32>
    tpu.vector_store %arg5[%c0_162, %c0_163, %c0_164], %264 {strides = array<i32>} : memref<1x8x64xf32, #tpu.memory_space<vmem>>, vector<1x8x64xf32>,
    %c0_165 = arith.constant 0 : index
    %c0_166 = arith.constant 0 : index
    %c0_167 = arith.constant 0 : index
    %265 = vector.load %arg6[%c0_165, %c0_166, %c0_167] : memref<1x8x64xf32, #tpu.memory_space<vmem>>, vector<1x8x64xf32>
    %266 = vector.shape_cast %265 : vector<1x8x64xf32> to vector<8x64xf32>
    %267 = vector.shape_cast %129 : vector<8x64xf32> to vector<1x8x64xf32>
    tpu.vector_store %arg6[%c0_165, %c0_166, %c0_167], %267 {strides = array<i32>} : memref<1x8x64xf32, #tpu.memory_space<vmem>>, vector<1x8x64xf32>,
    return
  }
  func.func @transform_0(%arg0: i32) -> (i32, i32, i32) {
    %c0_i32 = arith.constant 0 : i32
    %c0_i32_0 = arith.constant 0 : i32
    %c0_i32_1 = arith.constant 0 : i32
    return %arg0, %c0_i32, %c0_i32_0 : i32, i32, i32
  }
  func.func @transform_1(%arg0: i32) -> (i32, i32, i32) {
    %c0_i32 = arith.constant 0 : i32
    %c0_i32_0 = arith.constant 0 : i32
    %c0_i32_1 = arith.constant 0 : i32
    return %arg0, %c0_i32, %c0_i32_0 : i32, i32, i32
  }
  func.func @transform_2(%arg0: i32) -> (i32, i32) {
    %c0_i32 = arith.constant 0 : i32
    %c0_i32_0 = arith.constant 0 : i32
    %c0_i32_1 = arith.constant 0 : i32
    return %c0_i32, %c0_i32_0 : i32, i32
  }
  func.func @transform_3(%arg0: i32) -> (i32, i32) {
    %c0_i32 = arith.constant 0 : i32
    %c0_i32_0 = arith.constant 0 : i32
    %c0_i32_1 = arith.constant 0 : i32
    return %c0_i32, %c0_i32_0 : i32, i32
  }
  func.func @transform_4(%arg0: i32) -> (i32, i32, i32) {
    %c0_i32 = arith.constant 0 : i32
    %c0_i32_0 = arith.constant 0 : i32
    %c0_i32_1 = arith.constant 0 : i32
    return %arg0, %c0_i32, %c0_i32_0 : i32, i32, i32
  }
  func.func @transform_5(%arg0: i32) -> (i32, i32, i32) {
    %c0_i32 = arith.constant 0 : i32
    %c0_i32_0 = arith.constant 0 : i32
    %c0_i32_1 = arith.constant 0 : i32
    return %arg0, %c0_i32, %c0_i32_0 : i32, i32, i32
  }
}

</mosaic_0001>

<bundles_post_ra>
// kernel: edge_attention_module.1
= control target key start
LH: loop header
LB: loop body
LE: loop exit
PB: predicated region body
PF: predicated region fallthrough
CT: control target
= control target key end

     0   :  { %s2606_s18 = smov 0   ;;  %s3043_s0 = inlined_call_operand.vmem [shape: f32[2,40,64], index: 0, kind: input, shape index: {}]   ;;  %s3044_s1 = inlined_call_operand.vmem [shape: f32[2,40,64], index: 1, kind: input, shape index: {}]   ;;  %s3045_s2 = inlined_call_operand.vmem [shape: f32[8,532], index: 2, kind: input, shape index: {}]   ;;  %s3046_s3 = inlined_call_operand.vmem [shape: f32[2,64], index: 3, kind: input, shape index: {}]   ;;  %s3047_s4 = inlined_call_operand.vmem [shape: f32[2,8,64], index: 4, kind: output, shape index: {0}]   ;;  %s3048_s5 = inlined_call_operand.vmem [shape: f32[2,8,64], index: 5, kind: output, shape index: {1}]  }
   0x1 LB: > { %s1831_s19 = sadd.s32 4294967295, %s2533_s18   ;;  %p1835_p0 = scmp.ge.s32.totalorder %s2533_s18, 1  ;;  %s2533_s18 = sphi %s2606_s18, %s16_s18  }
   0x2   : > { %p200_p1 = scmp.lt.s32.totalorder %s2533_s18, 3 }
   0x4   : > { %p201_p2 = pnand %p1835_p0, %p200_p1 }
   0x5   : > { %v2617_v0 = vld [vmem:[%s3045_s2 + $0x10] sm:$0xff] (!%p201_p2)  ;;  %p236_p3 = scmp.lt.s32.totalorder (!%p201_p2), %s1831_s19, 1  ;;  %s2535_s22 = smov (!%p201_p2), 118   ;;  %v2536_v1 = vmov (!%p201_p2), 0.0|0.0   ;;  %v2537_v2 = vmov (!%p201_p2), 0.0   ;;  %vm2538_vm0 = vmmov (!%p201_p2), 0  }
   0x6   : > { %204 = sbr.rel (%p201_p2) target bundleno = 2793 (0xae9), region = 36  ;;  %269 = vrot.lane.b32.xlu0 (!%p201_p2), %v2617_v0, %s2535_s22  ;;  %2097 = vmatprep.subr.bf16.mxu0 (!%p201_p2), %v2536_v1  ;;  %256 = vst [vmem:[#allocation2] sm:$0xff] (!%p201_p2), %v2537_v2  ;;  %v2539_v3 = vmov (!%p201_p2), 123   ;;  %v2540_v4 = vmov (!%p201_p2), 122   ;;  %v1845_v5 = vld [vmem:[%s3046_s3 + $0x1] ss:$0 sm:$0xff] (!%p201_p2) }
   0x7   : > { %1945 = vmatprep.mubr.msk.f32.mxu0 (!%p201_p2), %vm2538_vm0, %v2537_v2  ;;  %2232 = vset.pattern.permute.xlu1 (!%p201_p2), %v2539_v3  ;;  %vm257_vm1 = vcmask (!%p201_p2), 1048064   ;;  %vm259_vm2 = vcmask (!%p201_p2), 523264   ;;  %s2541_s29 = smov (!%p201_p2), 121   ;;  %v1844_v11 = vld [vmem:[%s3046_s3] ss:$0 sm:$0xff] (!%p201_p2)  ;;  %s2542_s7 = smov (!%p201_p2), 1  }
   0x8   : > { %354 = vperm.xlu1 (!%p201_p2), %2232, %v2617_v0   ;;  %2231 = vset.pattern.permute.xlu0 (!%p201_p2), %v2540_v4  ;;  %258 = vst.msk [vmem:[#allocation2 + $0x8] sm:$0xff] (!%p201_p2), %vm257_vm1, %v2537_v2  ;;  %s2543_s8 = smov (!%p201_p2), 127   ;;  %s2544_s9 = smov (!%p201_p2), 9   ;;  %vm274_vm3 = vcmask (!%p201_p2), 1043456   ;;  %vm271_vm4 = vcmask (!%p201_p2), 293888   ;;  %vm493_vm5 = vcmask (!%p201_p2), 1039360  }
   0x9   : > { %2103 = vmatprep.subr.bf16.mxu1 (!%p201_p2), %v2536_v1  ;;  %1971 = vmatprep.mubr.msk.f32.mxu1 (!%p201_p2), %vm2538_vm0, %v2537_v2  ;;  %s2545_s10 = smov (!%p201_p2), 7   ;;  %s2546_s11 = smov (!%p201_p2), 119   ;;  %vm501_vm6 = vcmask (!%p201_p2), 1031168   ;;  %vm509_vm7 = vcmask (!%p201_p2), 982016   ;;  %v2552_v4 = vmov (!%p201_p2), 126   ;;  %vm554_vm8 = vcmask (!%p201_p2), 72704  }
   0xa   : > { %349 = vperm.xlu0 (!%p201_p2), %2231, %v2617_v0   ;;  %s2547_s12 = smov (!%p201_p2), 126   ;;  %s2548_s13 = smov (!%p201_p2), 120   ;;  %vm361_vm9 = vcmask (!%p201_p2), 31744   ;;  %vm568_vm10 = vcmask (!%p201_p2), 588800   ;;  %vm881_vm11 = vcmask (!%p201_p2), 457728   ;;  %vm1417_vm12 = vcmask (!%p201_p2), 80896  }
   0xb   : > { %s2549_s14 = smov (!%p201_p2), 112   ;;  %s2550_s15 = smov (!%p201_p2), 111   ;;  %vm1598_vm13 = vcmask (!%p201_p2), 539648  }
   0xc   : > { %465 = vrot.lane.b32.xlu1 (!%p201_p2), %v1845_v5, %s2541_s29  ;;  %s2551_s16 = smov (!%p201_p2), 110   ;;  %s2554_s17 = smov (!%p201_p2), 10  }
   0xd   : > { %s3050_s19 = smov (!%p236_p3, %s1831_s19), 1  ;;  %2278 = vset.pattern.permute.xlu1 %v2552_v4  ;;  %s2555_s20 = smov 82  }
   0xe   : > { %s2181_s23 = smul.u32 40, %s3050_s19  ;;  %475 = vrot.lane.b32.xlu0 %v1845_v5, %s2542_s7  ;;  %s2565_s7 = smov 20  }
  0x10   : > { %s2642_s28 = scalar_lea.vmem %s3044_s1, %s2181_s23  ;;  %470 = vrot.lane.b32.xlu1 %v1844_v11, %s2543_s8  ;;  %s2796_s29 = scalar_lea.vmem %s3043_s0, %s2181_s23 }
  0x11   : > { %v261_v6 = vld [vmem:[%s2642_s28] sm:$0xff]  ;;  %v262_v7 = vld [vmem:[%s2642_s28 + $0x8] sm:$0xff]  ;;  %v263_v8 = vld [vmem:[%s2642_s28 + $0x10] sm:$0xff]  ;;  %s2562_s23 = smov 56  }
  0x12   : > { %v2098_v9 = vpack.c.bf16 %v262_v7, %v261_v6  ;;  %v264_v10 = vld [vmem:[%s2642_s28 + $0x18] sm:$0xff]  ;;  %483 = vrot.lane.b32.xlu0 %v1845_v5, %s2544_s9  ;;  %v265_v13 = vld [vmem:[%s2642_s28 + $0x20] sm:$0xf]  ;;  %v266_v49 = vld [vmem:[%s2642_s28 + $0x24] sm:$0xf]  ;;  %v2553_v5 = vmov 124  }
  0x13   : > { %v2101_v12 = vpack.c.bf16 %v264_v10, %v263_v8  ;;  %2279 = vset.pattern.permute.xlu0 %v2553_v5  ;;  %v2556_v6 = vmov 127   ;;  %v2557_v7 = vmov 125  }
  0x14   : > { %2099 = vmatpush3.bf16.msra.mxu0 %v2098_v9  ;;  %479 = vrot.lane.b32.xlu1 %v1844_v11, %s2545_s10  ;;  %s2566_s10 = smov 92  }
  0x15   : > { %2100 = vmatprep.subr.bf16.mxu0 %v2536_v1 }
  0x18   : > { %2102 = vmatpush3.bf16.msra.mxu0 %v2101_v12  ;;  %455 = vrot.lane.b32.xlu1 %v1844_v11, %s2546_s11 }
  0x19   : > { %1943 = vmatprep.subr.mxu0 %v2537_v2 }
  0x1c   : > { %1944 = vmatpush3.msk.msra.mxu0 %vm274_vm3, %v265_v13 }
  0x1d   : > { %1948 = vmatprep.subr.mxu0 %v2537_v2 }
  0x78   : > { %v270_v14 = vpop.permute.xlu0 %269 }
  0x79   : > { %1946 = vmatmul.mubr.msk.f32.vlgmr.msra.gmra.mrb[0].mxu0 %vm271_vm4, %v270_v14 }
  0x7a   : > { %1950 = vmatprep.mubr.msk.f32.mxu0 %vm2538_vm0, %v2537_v2  ;;  %1949 = vmatpush3.msk.msra.mxu0 %vm274_vm3, %v266_v49 }
  0x7b   : > { %2115 = vmatprep.subr.bf16.mxu0 %v2536_v1 }
  0x87   : > { %v355_v16 = vpop.permute.xlu1 %354 }
  0x89   : > { %v350_v15 = vpop.permute.xlu0 %349 }
  0x8b   : > { %v2662_v22 = vpop.permute.xlu1 %465 }
  0x8c   : > { %v2668_v25 = vmul.f32 0.0, %v2662_v22 }
  0x8d   : > { %v2682_v33 = vpop.permute.xlu0 %475 }
  0x8f   : > { %v2665_v23 = vpop.permute.xlu1 %470 }
  0x90   : > { %v2673_v28 = vmul.f32 0.0, %v2665_v23 }
  0x91   : > { %v2691_v37 = vpop.permute.xlu0 %483 }
  0x93   : > { %v2678_v31 = vpop.permute.xlu1 %479 }
  0x97   : > { %v2687_v35 = vpop.permute.xlu1 %455 }
  0x98   : > { %v2695_v38 = vmul.f32 0.0, %v2687_v35 }
 0x14c   : > { %v344_v17 = vpop.f32.mrb[0].mxu0 }
 0x14d   : > { %v352_v18 = vmul.f32 %v350_v15, %v344_v17  ;;  %v1947_v19 = vpop.f32.mrb[1].mxu0 }
 0x14f   : > { %v357_v20 = vadd.f32 %v355_v16, %v352_v18 }
 0x151   : > { %v358_v21 = vmax.f32 %v357_v20, 0.0 }
 0x153   : > { %447 = vst.msk [vmem:[#allocation2 + $0x8] sm:$0xff] %vm259_vm2, %v358_v21 }
 0x15a   : > { %v449_v24 = vld [vmem:[#allocation2 + $0x8] sm:$0xff] }
 0x15b   : > { %v2233_v26 = vpack.i.bf16 %v449_v24, %v2537_v2  ;;  %v469_v27 = vmul.f32 %v2662_v22, %v449_v24  ;;  %v474_v29 = vmul.f32 %v2665_v23, %v449_v24  ;;  %v478_v34 = vmul.f32 %v2682_v33, %v449_v24 }
 0x15c   : > { %v482_v36 = vmul.f32 %v2678_v31, %v449_v24  ;;  %v459_v39 = vmul.f32 %v2687_v35, %v449_v24  ;;  %v486_v40 = vmul.f32 %v2691_v37, %v449_v24 }
 0x15d   : > { %2234 = vrot.lane.b32.xlu0 %v2233_v26, %s2543_s8  ;;  %v2238_v30 = vpack.i.bf16 %v469_v27, %v2668_v25  ;;  %v2243_v32 = vpack.i.bf16 %v474_v29, %v2673_v28 }
 0x15e   : > { %v2248_v41 = vpack.i.bf16 %v459_v39, %v2695_v38 }
 0x15f   : > { %2239 = vrot.lane.b32.xlu1 %v2238_v30, %s2547_s12 }
 0x161   : > { %2244 = vrot.lane.b32.xlu0 %v2243_v32, %s2548_s13 }
 0x163   : > { %511 = vrot.lane.b32.xlu1 %v449_v24, %s2546_s11 }
 0x165   : > { %514 = vrot.lane.b32.xlu0 %v478_v34, %s2535_s22 }
 0x167   : > { %517 = vrot.lane.b32.xlu1 %v482_v36, %s2549_s14 }
 0x169   : > { %519 = vrot.lane.b32.xlu0 %v449_v24, %s2550_s15 }
 0x16b   : > { %522 = vrot.lane.b32.xlu1 %v486_v40, %s2551_s16 }
 0x16d   : > { %2249 = vrot.lane.b32.xlu0 %v2248_v41, %s2544_s9 }
 0x1cf   : > { %v2235_v42 = vpop.permute.xlu0 %2234 }
 0x1d0   : > { %v2237_v43 = vunpack.i.h.bf16 %v2235_v42  ;;  %v2236_v44 = vunpack.i.l.bf16 %v2235_v42 }
 0x1d1   : > { %v2240_v45 = vpop.permute.xlu1 %2239 }
 0x1d2   : > { %v2242_v46 = vunpack.i.h.bf16 %v2240_v45  ;;  %v2241_v47 = vunpack.i.l.bf16 %v2240_v45  ;;  %v494_v48 = vsel %vm493_vm5, %v2236_v44, %v2237_v43 }
 0x1d3   : > { %v2245_v50 = vpop.permute.xlu0 %2244  ;;  %v2253_v51 = vpack.i.bf16 %v2237_v43, %v494_v48 }
 0x1d4   : > { %v2247_v52 = vunpack.i.h.bf16 %v2245_v50  ;;  %v2246_v53 = vunpack.i.l.bf16 %v2245_v50  ;;  %v502_v54 = vsel %vm501_vm6, %v2241_v47, %v2242_v46 }
 0x1d5   : > { %2254 = vrot.lane.b32.xlu1 %v2253_v51, %s2544_s9  ;;  %v512_v55 = vpop.permute.xlu1 %511  ;;  %v2258_v56 = vpack.i.bf16 %v2242_v46, %v502_v54 }
 0x1d6   : > { %v510_v57 = vsel %vm509_vm7, %v2246_v53, %v2247_v52 }
 0x1d7   : > { %v515_v58 = vpop.permute.xlu0 %514  ;;  %2259 = vrot.lane.b32.xlu0 %v2258_v56, %s2544_s9  ;;  %v2263_v59 = vpack.i.bf16 %v2247_v52, %v510_v57 }
 0x1d8   : > { %v2268_v60 = vpack.i.bf16 %v515_v58, %v512_v55 }
 0x1d9   : > { %2264 = vrot.lane.b32.xlu1 %v2263_v59, %s2544_s9  ;;  %v518_v61 = vpop.permute.xlu1 %517 }
 0x1db   : > { %v520_v62 = vpop.permute.xlu0 %519  ;;  %2269 = vrot.lane.b32.xlu0 %v2268_v60, %s2544_s9 }
 0x1dc   : > { %v2273_v63 = vpack.i.bf16 %v520_v62, %v518_v61 }
 0x1dd   : > { %v523_v3 = vpop.permute.xlu1 %522 }
 0x1de   : > { %2274 = vrot.lane.b32.xlu1 %v2273_v63, %s2544_s9 }
 0x1df   : > { %552 = vrot.lane.b32.xlu0 %v523_v3, %s2544_s9  ;;  %v2250_v8 = vpop.permute.xlu0 %2249 }
 0x1e0   : > { %v2252_v9 = vunpack.i.h.bf16 %v2250_v8  ;;  %v2251_v10 = vunpack.i.l.bf16 %v2250_v8 }
 0x1e2   : > { %359 = vrot.lane.b32.xlu1 %v2617_v0, %s2554_s17  ;;  %v555_v17 = vsel %vm554_vm8, %v2251_v10, %v2252_v9 }
 0x1e3   : > { %524 = vrot.lane.b32.xlu0 %v2617_v0, %s2555_s20 }
 0x1e6   : > { %438 = vperm.xlu1 %2278, %v2617_v0  }
 0x1e7   : > { %642 = vperm.xlu0 %2279, %v2617_v0  }
 0x1ea   : > { %2280 = vset.pattern.permute.xlu1 %v2556_v6 }
 0x1eb   : > { %443 = vperm.xlu1 %2280, %v2617_v0  }
 0x1ef   : > { %2281 = vset.pattern.permute.xlu1 %v2557_v7 }
 0x1f0   : > { %647 = vperm.xlu1 %2281, %v2617_v0  }
 0x247   : > { %v2255_v11 = vpop.permute.xlu1 %2254 }
 0x248   : > { %v2257_v12 = vunpack.i.h.bf16 %v2255_v11  ;;  %v2256_v13 = vunpack.i.l.bf16 %v2255_v11 }
 0x249   : > { %v2260_v14 = vpop.permute.xlu0 %2259 }
 0x24a   : > { %v2262_v15 = vunpack.i.h.bf16 %v2260_v14  ;;  %v2261_v16 = vunpack.i.l.bf16 %v2260_v14  ;;  %v556_v18 = vsel %vm554_vm8, %v2256_v13, %v2257_v12 }
 0x24b   : > { %v2265_v19 = vpop.permute.xlu1 %2264  ;;  %v2104_v20 = vpack.c.bf16 %v556_v18, %v555_v17 }
 0x24c   : > { %v2267_v21 = vunpack.i.h.bf16 %v2265_v19  ;;  %v2266_v24 = vunpack.i.l.bf16 %v2265_v19  ;;  %v557_v0 = vsel %vm554_vm8, %v2261_v16, %v2262_v15 }
 0x24d   : > { %v2270_v26 = vpop.permute.xlu0 %2269  ;;  %2105 = vmatpush3.bf16.msra.mxu1 %v2104_v20 }
 0x24e   : > { %2106 = vmatprep.subr.bf16.mxu1 %v2536_v1  ;;  %v558_v27 = vsel %vm554_vm8, %v2266_v24, %v2267_v21  ;;  %v2272_v29 = vunpack.i.h.bf16 %v2270_v26  ;;  %v2271_v30 = vunpack.i.l.bf16 %v2270_v26 }
 0x24f   : > { %v2107_v32 = vpack.c.bf16 %v558_v27, %v557_v0 }
 0x250   : > { %v2275_v34 = vpop.permute.xlu1 %2274  ;;  %v2110_v40 = vpack.c.bf16 %v2272_v29, %v2271_v30 }
 0x251   : > { %2108 = vmatpush3.bf16.msra.mxu1 %v2107_v32  ;;  %v2277_v36 = vunpack.i.h.bf16 %v2275_v34  ;;  %v2276_v39 = vunpack.i.l.bf16 %v2275_v34  ;;  %v553_v42 = vpop.permute.xlu0 %552 }
 0x252   : > { %2109 = vmatprep.subr.bf16.mxu1 %v2536_v1 }
 0x253   : > { %v2113_v43 = vpack.c.bf16 %v2277_v36, %v2276_v39  ;;  %v2774_v39 = vld [vmem:[%s3045_s2 + $0x20] sm:$0xff] }
 0x254   : > { %v360_v41 = vpop.permute.xlu1 %359 }
 0x255   : > { %2111 = vmatpush3.bf16.msra.mxu1 %v2110_v40  ;;  %1951 = vmatmul.mubr.msk.f32.vlgmr.msra.gmra.mrb[2].mxu0 %vm361_vm9, %v360_v41  ;;  %v525_v44 = vpop.permute.xlu0 %524  ;;  %v2558_v40 = vmov 16   ;;  %v2559_v41 = vmov 17  }
 0x256   : > { %2112 = vmatprep.subr.bf16.mxu1 %v2536_v1  ;;  %1992 = vmatprep.mubr.msk.f32.mxu0 %vm2538_vm0, %v2537_v2 }
 0x257   : > { %2327 = vset.pattern.permute.xlu1 %v2558_v40  ;;  %2328 = vset.pattern.permute.xlu0 %v2559_v41 }
 0x259   : > { %2114 = vmatpush3.bf16.msra.mxu1 %v2113_v43  ;;  %v2560_v43 = vmov 112  }
 0x25a   : > { %1969 = vmatprep.subr.mxu1 %v2537_v2 }
 0x25d   : > { %1970 = vmatpush3.msra.mxu1 %v553_v42  ;;  %v2781_v42 = vld [vmem:[%s3045_s2] sm:$0xff] }
 0x25e   : > { %1972 = vmatmul.mubr.msk.f32.vlgmr.msra.gmra.mrb[0].mxu1 %vm568_vm10, %v525_v44  ;;  %2127 = vmatprep.subr.bf16.mxu1 %v2536_v1  ;;  %v2561_v44 = vmov 113  }
 0x25f   : > { %2013 = vmatprep.mubr.msk.f32.mxu1 %vm2538_vm0, %v2537_v2 }
 0x265   : > { %v439_v45 = vpop.permute.xlu1 %438 }
 0x266   : > { %v643_v49 = vpop.permute.xlu0 %642 }
 0x26a   : > { %v444_v48 = vpop.permute.xlu1 %443 }
 0x26f   : > { %v648_v52 = vpop.permute.xlu1 %647 }
 0x328   : > { %v433_v46 = vpop.f32.mrb[2].mxu0 }
 0x329   : > { %v1952_v47 = vpop.f32.mrb[3].mxu0  ;;  %v441_v50 = vmul.f32 %v439_v45, %v433_v46 }
 0x32b   : > { %v446_v55 = vadd.f32 %v444_v48, %v441_v50 }
 0x331   : > { %v637_v51 = vpop.f32.mrb[0].mxu1 }
 0x332   : > { %v645_v53 = vmul.f32 %v643_v49, %v637_v51  ;;  %v1973_v54 = vpop.f32.mrb[1].mxu1 }
 0x334   : > { %v650_v56 = vadd.f32 %v648_v52, %v645_v53 }
 0x336   : > { %v2737_v57 = vadd.f32 %v650_v56, %v446_v55 }
 0x338   : > { %v652_v58 = vmax.f32 %v2737_v57, 0.0 }
 0x33a   : > { %655 = vst.msk [vmem:[#allocation2 + $0x8] sm:$0xff] %vm259_vm2, %v652_v58 }
 0x341   : > { %v657_v59 = vld [vmem:[#allocation2 + $0x8] sm:$0xff] }
 0x342   : > { %v2282_v60 = vpack.i.bf16 %v657_v59, %v2537_v2  ;;  %v661_v61 = vmul.f32 %v657_v59, %v2662_v22  ;;  %v663_v62 = vmul.f32 %v657_v59, %v2665_v23  ;;  %v664_v4 = vmul.f32 %v657_v59, %v2682_v33 }
 0x343   : > { %v665_v5 = vmul.f32 %v657_v59, %v2678_v31  ;;  %v659_v6 = vmul.f32 %v657_v59, %v2687_v35  ;;  %v666_v7 = vmul.f32 %v657_v59, %v2691_v37 }
 0x344   : > { %2283 = vrot.lane.b32.xlu0 %v2282_v60, %s2543_s8  ;;  %v2287_v63 = vpack.i.bf16 %v661_v61, %v2668_v25  ;;  %v2292_v3 = vpack.i.bf16 %v663_v62, %v2673_v28 }
 0x345   : > { %v2297_v8 = vpack.i.bf16 %v659_v6, %v2695_v38 }
 0x346   : > { %2288 = vrot.lane.b32.xlu1 %v2287_v63, %s2547_s12 }
 0x348   : > { %2293 = vrot.lane.b32.xlu0 %v2292_v3, %s2548_s13 }
 0x34a   : > { %688 = vrot.lane.b32.xlu1 %v657_v59, %s2546_s11 }
 0x34c   : > { %691 = vrot.lane.b32.xlu0 %v664_v4, %s2535_s22 }
 0x34e   : > { %694 = vrot.lane.b32.xlu1 %v665_v5, %s2549_s14 }
 0x350   : > { %696 = vrot.lane.b32.xlu0 %v657_v59, %s2550_s15 }
 0x352   : > { %699 = vrot.lane.b32.xlu1 %v666_v7, %s2551_s16 }
 0x354   : > { %2298 = vrot.lane.b32.xlu0 %v2297_v8, %s2544_s9 }
 0x3b6   : > { %v2284_v9 = vpop.permute.xlu0 %2283 }
 0x3b7   : > { %v2286_v10 = vunpack.i.h.bf16 %v2284_v9  ;;  %v2285_v11 = vunpack.i.l.bf16 %v2284_v9 }
 0x3b8   : > { %v2289_v12 = vpop.permute.xlu1 %2288 }
 0x3b9   : > { %v673_v13 = vsel %vm493_vm5, %v2285_v11, %v2286_v10  ;;  %v2291_v14 = vunpack.i.h.bf16 %v2289_v12  ;;  %v2290_v15 = vunpack.i.l.bf16 %v2289_v12  ;;  %v1008_v12 = vld [vmem:[%s2796_s29] sm:$0xff] }
 0x3ba   : > { %v2302_v16 = vpack.i.bf16 %v2286_v10, %v673_v13  ;;  %v2294_v17 = vpop.permute.xlu0 %2293  ;;  %v1009_v13 = vld [vmem:[%s2796_s29 + $0x8] sm:$0xff] }
 0x3bb   : > { %v2296_v18 = vunpack.i.h.bf16 %v2294_v17  ;;  %v2295_v19 = vunpack.i.l.bf16 %v2294_v17  ;;  %v680_v20 = vsel %vm501_vm6, %v2290_v15, %v2291_v14  ;;  %v2140_v15 = vpack.c.bf16 %v1009_v13, %v1008_v12  ;;  %v1010_v17 = vld [vmem:[%s2796_s29 + $0x10] sm:$0xff] }
 0x3bc   : > { %2303 = vrot.lane.b32.xlu1 %v2302_v16, %s2544_s9  ;;  %v689_v21 = vpop.permute.xlu1 %688  ;;  %v2307_v24 = vpack.i.bf16 %v2291_v14, %v680_v20  ;;  %v2805_v14 = vld [vmem:[%s3045_s2 + $0x18] sm:$0xff]  ;;  %v1012_v20 = vld [vmem:[%s2796_s29 + $0x20] sm:$0xf] }
 0x3bd   : > { %v687_v26 = vsel %vm509_vm7, %v2295_v19, %v2296_v18 }
 0x3be   : > { %v2312_v0 = vpack.i.bf16 %v2296_v18, %v687_v26  ;;  %v692_v27 = vpop.permute.xlu0 %691  ;;  %2308 = vrot.lane.b32.xlu0 %v2307_v24, %s2544_s9  ;;  %v1011_v18 = vld [vmem:[%s2796_s29 + $0x18] sm:$0xff] }
 0x3bf   : > { %v2317_v29 = vpack.i.bf16 %v692_v27, %v689_v21  ;;  %v2143_v19 = vpack.c.bf16 %v1011_v18, %v1010_v17 }
 0x3c0   : > { %2313 = vrot.lane.b32.xlu1 %v2312_v0, %s2544_s9  ;;  %v695_v30 = vpop.permute.xlu1 %694 }
 0x3c2   : > { %v697_v32 = vpop.permute.xlu0 %696  ;;  %2318 = vrot.lane.b32.xlu0 %v2317_v29, %s2544_s9 }
 0x3c3   : > { %v2322_v34 = vpack.i.bf16 %v697_v32, %v695_v30 }
 0x3c4   : > { %v700_v36 = vpop.permute.xlu1 %699 }
 0x3c5   : > { %2323 = vrot.lane.b32.xlu1 %v2322_v34, %s2544_s9 }
 0x3c6   : > { %727 = vrot.lane.b32.xlu0 %v700_v36, %s2544_s9  ;;  %v2299_v45 = vpop.permute.xlu0 %2298 }
 0x3c7   : > { %v2301_v46 = vunpack.i.h.bf16 %v2299_v45  ;;  %v2300_v47 = vunpack.i.l.bf16 %v2299_v45 }
 0x3c9   : > { %817 = vperm.xlu1 %2327, %v2774_v39   ;;  %v729_v52 = vsel %vm554_vm8, %v2300_v47, %v2301_v46 }
 0x3ca   : > { %822 = vperm.xlu0 %2328, %v2774_v39  }
 0x3cd   : > { %2329 = vset.pattern.permute.xlu1 %v2560_v43 }
 0x3ce   : > { %1092 = vperm.xlu1 %2329, %v2781_v42  }
 0x3d2   : > { %2330 = vset.pattern.permute.xlu1 %v2561_v44 }
 0x3d3   : > { %1097 = vperm.xlu1 %2330, %v2781_v42  }
 0x42e   : > { %v2304_v48 = vpop.permute.xlu1 %2303 }
 0x42f   : > { %v2306_v49 = vunpack.i.h.bf16 %v2304_v48  ;;  %v2305_v50 = vunpack.i.l.bf16 %v2304_v48 }
 0x430   : > { %v2309_v51 = vpop.permute.xlu0 %2308 }
 0x431   : > { %v730_v53 = vsel %vm554_vm8, %v2305_v50, %v2306_v49  ;;  %v2311_v54 = vunpack.i.h.bf16 %v2309_v51  ;;  %v2310_v55 = vunpack.i.l.bf16 %v2309_v51 }
 0x432   : > { %v2116_v56 = vpack.c.bf16 %v730_v53, %v729_v52  ;;  %v2314_v59 = vpop.permute.xlu1 %2313 }
 0x433   : > { %v2316_v60 = vunpack.i.h.bf16 %v2314_v59  ;;  %v2315_v61 = vunpack.i.l.bf16 %v2314_v59  ;;  %v731_v63 = vsel %vm554_vm8, %v2310_v55, %v2311_v54 }
 0x434   : > { %v2319_v62 = vpop.permute.xlu0 %2318  ;;  %2117 = vmatpush3.bf16.msra.mxu0 %v2116_v56 }
 0x435   : > { %v732_v3 = vsel %vm554_vm8, %v2315_v61, %v2316_v60  ;;  %2118 = vmatprep.subr.bf16.mxu0 %v2536_v1  ;;  %v2321_v5 = vunpack.i.h.bf16 %v2319_v62  ;;  %v2320_v6 = vunpack.i.l.bf16 %v2319_v62 }
 0x436   : > { %v2119_v4 = vpack.c.bf16 %v732_v3, %v731_v63 }
 0x437   : > { %v2324_v7 = vpop.permute.xlu1 %2323  ;;  %v2122_v8 = vpack.c.bf16 %v2321_v5, %v2320_v6 }
 0x438   : > { %2120 = vmatpush3.bf16.msra.mxu0 %v2119_v4  ;;  %v2326_v9 = vunpack.i.h.bf16 %v2324_v7  ;;  %v2325_v10 = vunpack.i.l.bf16 %v2324_v7  ;;  %v728_v16 = vpop.permute.xlu0 %727 }
 0x439   : > { %2121 = vmatprep.subr.bf16.mxu0 %v2536_v1 }
 0x43a   : > { %v2125_v11 = vpack.c.bf16 %v2326_v9, %v2325_v10 }
 0x43c   : > { %2123 = vmatpush3.bf16.msra.mxu0 %v2122_v8 }
 0x43d   : > { %2124 = vmatprep.subr.bf16.mxu0 %v2536_v1 }
 0x440   : > { %2126 = vmatpush3.bf16.msra.mxu0 %v2125_v11 }
 0x441   : > { %1990 = vmatprep.subr.mxu0 %v2537_v2 }
 0x444   : > { %1991 = vmatpush3.msra.mxu0 %v728_v16 }
 0x445   : > { %1993 = vmatmul.mubr.msk.f32.vlgmr.msra.gmra.mrb[4].mxu0 %vm568_vm10, %v2805_v14  ;;  %2139 = vmatprep.subr.bf16.mxu0 %v2536_v1 }
 0x446   : > { %2141 = vmatpush3.bf16.msra.mxu0 %v2140_v15  ;;  %2026 = vmatprep.mubr.msk.f32.mxu0 %vm2538_vm0, %v2537_v2 }
 0x447   : > { %2142 = vmatprep.subr.bf16.mxu0 %v2536_v1 }
 0x448   : > { %v818_v21 = vpop.permute.xlu1 %817 }
 0x449   : > { %v823_v26 = vpop.permute.xlu0 %822 }
 0x44a   : > { %2144 = vmatpush3.bf16.msra.mxu0 %v2143_v19 }
 0x44b   : > { %2024 = vmatprep.subr.mxu0 %v2537_v2 }
 0x44d   : > { %v1093_v30 = vpop.permute.xlu1 %1092 }
 0x44e   : > { %2025 = vmatpush3.msk.msra.mxu0 %vm274_vm3, %v1012_v20 }
 0x44f   : > { %2027 = vmatmul.mubr.msk.f32.vlgmr.msra.gmra.mrb[6].mxu0 %vm271_vm4, %v2781_v42  ;;  %2029 = vmatprep.subr.mxu0 %v2537_v2 }
 0x450   : > { %2031 = vmatprep.mubr.msk.f32.mxu0 %vm2538_vm0, %v2537_v2 }
 0x452   : > { %v1098_v36 = vpop.permute.xlu1 %1097 }
 0x518   : > { %v811_v24 = vpop.f32.mrb[4].mxu0 }
 0x519   : > { %v820_v0 = vmul.f32 %v818_v21, %v811_v24  ;;  %v1994_v27 = vpop.f32.mrb[5].mxu0 }
 0x51b   : > { %v825_v29 = vadd.f32 %v823_v26, %v820_v0 }
 0x51d   : > { %v826_v32 = vmax.f32 %v825_v29, 0.0 }
 0x51f   : > { %829 = vst.msk [vmem:[#allocation2 + $0x8] sm:$0xff] %vm259_vm2, %v826_v32 }
 0x522   : > { %v1087_v34 = vpop.f32.mrb[6].mxu0 }
 0x523   : > { %v1095_v40 = vmul.f32 %v1093_v30, %v1087_v34  ;;  %v2028_v41 = vpop.f32.mrb[7].mxu0 }
 0x525   : > { %v1100_v43 = vadd.f32 %v1098_v36, %v1095_v40 }
 0x526   : > { %v831_v44 = vld [vmem:[#allocation2 + $0x8] sm:$0xff] }
 0x527   : > { %v1101_v45 = vmax.f32 %v1100_v43, 0.0  ;;  %v2331_v46 = vpack.i.bf16 %v831_v44, %v2537_v2  ;;  %v835_v47 = vmul.f32 %v831_v44, %v2662_v22  ;;  %v837_v48 = vmul.f32 %v831_v44, %v2665_v23 }
 0x528   : > { %v838_v51 = vmul.f32 %v831_v44, %v2682_v33  ;;  %v839_v52 = vmul.f32 %v831_v44, %v2678_v31  ;;  %v840_v56 = vmul.f32 %v831_v44, %v2691_v37  ;;  %v833_v3 = vmul.f32 %v831_v44, %v2687_v35 }
 0x529   : > { %1189 = vst.msk [vmem:[#allocation2 + $0x8] sm:$0xff] %vm259_vm2, %v1101_v45  ;;  %2332 = vrot.lane.b32.xlu0 %v2331_v46, %s2543_s8  ;;  %v2336_v49 = vpack.i.bf16 %v835_v47, %v2668_v25  ;;  %v2341_v50 = vpack.i.bf16 %v837_v48, %v2673_v28 }
 0x52a   : > { %v2361_v5 = vpack.i.bf16 %v833_v3, %v2695_v38 }
 0x52b   : > { %2337 = vrot.lane.b32.xlu1 %v2336_v49, %s2547_s12 }
 0x52d   : > { %2342 = vrot.lane.b32.xlu0 %v2341_v50, %s2548_s13 }
 0x52f   : > { %862 = vrot.lane.b32.xlu1 %v831_v44, %s2546_s11 }
 0x530   : > { %v1191_v53 = vld [vmem:[#allocation2 + $0x8] sm:$0xff] }
 0x531   : > { %865 = vrot.lane.b32.xlu0 %v838_v51, %s2535_s22  ;;  %v2346_v54 = vpack.i.bf16 %v1191_v53, %v2537_v2  ;;  %v1195_v55 = vmul.f32 %v1191_v53, %v2662_v22  ;;  %v1197_v59 = vmul.f32 %v1191_v53, %v2665_v23  ;;  %v1198_v62 = vmul.f32 %v1191_v53, %v2682_v33 }
 0x532   : > { %v1199_v63 = vmul.f32 %v1191_v53, %v2678_v31  ;;  %v1200_v4 = vmul.f32 %v1191_v53, %v2691_v37  ;;  %v1193_v29 = vmul.f32 %v1191_v53, %v2687_v35 }
 0x533   : > { %868 = vrot.lane.b32.xlu1 %v839_v52, %s2549_s14  ;;  %v2351_v60 = vpack.i.bf16 %v1195_v55, %v2668_v25  ;;  %v2356_v61 = vpack.i.bf16 %v1197_v59, %v2673_v28 }
 0x534   : > { %v2391_v36 = vpack.i.bf16 %v1193_v29, %v2695_v38 }
 0x535   : > { %870 = vrot.lane.b32.xlu0 %v831_v44, %s2550_s15 }
 0x537   : > { %2347 = vrot.lane.b32.xlu1 %v2346_v54, %s2543_s8 }
 0x539   : > { %873 = vrot.lane.b32.xlu0 %v840_v56, %s2551_s16 }
 0x53b   : > { %2352 = vrot.lane.b32.xlu1 %v2351_v60, %s2547_s12 }
 0x53d   : > { %2357 = vrot.lane.b32.xlu0 %v2356_v61, %s2548_s13  ;;  %v1013_v61 = vld [vmem:[%s2796_s29 + $0x24] sm:$0xf] }
 0x53e   : > { %2030 = vmatpush3.msk.msra.mxu0 %vm274_vm3, %v1013_v61 }
 0x53f   : > { %1222 = vrot.lane.b32.xlu1 %v1191_v53, %s2546_s11  ;;  %2157 = vmatprep.subr.bf16.mxu0 %v2536_v1 }
 0x541   : > { %1225 = vrot.lane.b32.xlu0 %v1198_v62, %s2535_s22 }
 0x543   : > { %1228 = vrot.lane.b32.xlu1 %v1199_v63, %s2549_s14 }
 0x545   : > { %1230 = vrot.lane.b32.xlu0 %v1191_v53, %s2550_s15 }
 0x547   : > { %1233 = vrot.lane.b32.xlu1 %v1200_v4, %s2551_s16  ;;  %v2563_v4 = vmov 114  }
 0x548   : > { %2422 = vset.pattern.permute.xlu1 %v2563_v4 }
 0x549   : > { %2362 = vrot.lane.b32.xlu0 %v2361_v5, %s2544_s9  ;;  %v2564_v5 = vmov 116  }
 0x54a   : > { %2421 = vset.pattern.permute.xlu0 %v2564_v5 }
 0x59b   : > { %v2333_v6 = vpop.permute.xlu0 %2332 }
 0x59c   : > { %v2335_v7 = vunpack.i.h.bf16 %v2333_v6  ;;  %v2334_v8 = vunpack.i.l.bf16 %v2333_v6  ;;  %v2567_v6 = vmov 115  }
 0x59d   : > { %v2338_v9 = vpop.permute.xlu1 %2337 }
 0x59e   : > { %v847_v10 = vsel %vm493_vm5, %v2334_v8, %v2335_v7  ;;  %v2340_v11 = vunpack.i.h.bf16 %v2338_v9  ;;  %v2339_v12 = vunpack.i.l.bf16 %v2338_v9 }
 0x59f   : > { %v2366_v13 = vpack.i.bf16 %v2335_v7, %v847_v10  ;;  %v2343_v15 = vpop.permute.xlu0 %2342  ;;  %v2568_v7 = vmov 117  }
 0x5a0   : > { %v854_v16 = vsel %vm501_vm6, %v2339_v12, %v2340_v11  ;;  %v2345_v17 = vunpack.i.h.bf16 %v2343_v15  ;;  %v2344_v18 = vunpack.i.l.bf16 %v2343_v15 }
 0x5a1   : > { %v2371_v19 = vpack.i.bf16 %v2340_v11, %v854_v16  ;;  %v863_v20 = vpop.permute.xlu1 %862  ;;  %2367 = vrot.lane.b32.xlu1 %v2366_v13, %s2544_s9 }
 0x5a2   : > { %v861_v21 = vsel %vm509_vm7, %v2344_v18, %v2345_v17 }
 0x5a3   : > { %v2376_v24 = vpack.i.bf16 %v2345_v17, %v861_v21  ;;  %v866_v26 = vpop.permute.xlu0 %865  ;;  %2372 = vrot.lane.b32.xlu0 %v2371_v19, %s2544_s9 }
 0x5a4   : > { %v2381_v0 = vpack.i.bf16 %v866_v26, %v863_v20 }
 0x5a5   : > { %v869_v27 = vpop.permute.xlu1 %868  ;;  %2377 = vrot.lane.b32.xlu1 %v2376_v24, %s2544_s9 }
 0x5a7   : > { %v871_v30 = vpop.permute.xlu0 %870  ;;  %2382 = vrot.lane.b32.xlu0 %v2381_v0, %s2544_s9 }
 0x5a8   : > { %v2386_v32 = vpack.i.bf16 %v871_v30, %v869_v27 }
 0x5a9   : > { %v2348_v34 = vpop.permute.xlu1 %2347 }
 0x5aa   : > { %v2350_v40 = vunpack.i.h.bf16 %v2348_v34  ;;  %v2349_v41 = vunpack.i.l.bf16 %v2348_v34  ;;  %2387 = vrot.lane.b32.xlu1 %v2386_v32, %s2544_s9 }
 0x5ab   : > { %v874_v43 = vpop.permute.xlu0 %873  ;;  %2392 = vrot.lane.b32.xlu0 %v2391_v36, %s2544_s9 }
 0x5ac   : > { %v1207_v44 = vsel %vm493_vm5, %v2349_v41, %v2350_v40 }
 0x5ad   : > { %v2353_v45 = vpop.permute.xlu1 %2352  ;;  %v2396_v49 = vpack.i.bf16 %v2350_v40, %v1207_v44 }
 0x5ae   : > { %v2355_v46 = vunpack.i.h.bf16 %v2353_v45  ;;  %v2354_v47 = vunpack.i.l.bf16 %v2353_v45  ;;  %877 = vrot.lane.b32.xlu1 %v2805_v14, %s2562_s23 }
 0x5af   : > { %v2358_v48 = vpop.permute.xlu0 %2357  ;;  %909 = vrot.lane.b32.xlu0 %v874_v43, %s2544_s9 }
 0x5b0   : > { %v2360_v50 = vunpack.i.h.bf16 %v2358_v48  ;;  %v2359_v51 = vunpack.i.l.bf16 %v2358_v48  ;;  %v1214_v52 = vsel %vm501_vm6, %v2354_v47, %v2355_v46 }
 0x5b1   : > { %v1223_v53 = vpop.permute.xlu1 %1222  ;;  %v2401_v56 = vpack.i.bf16 %v2355_v46, %v1214_v52 }
 0x5b2   : > { %v1221_v54 = vsel %vm509_vm7, %v2359_v51, %v2360_v50  ;;  %2397 = vrot.lane.b32.xlu1 %v2396_v49, %s2544_s9 }
 0x5b3   : > { %v1226_v55 = vpop.permute.xlu0 %1225  ;;  %879 = vrot.lane.b32.xlu0 %v2774_v39, %s2562_s23  ;;  %v2406_v59 = vpack.i.bf16 %v2360_v50, %v1221_v54 }
 0x5b4   : > { %v2411_v62 = vpack.i.bf16 %v1226_v55, %v1223_v53 }
 0x5b5   : > { %v1229_v14 = vpop.permute.xlu1 %1228 }
 0x5b6   : > { %2402 = vrot.lane.b32.xlu1 %v2401_v56, %s2544_s9 }
 0x5b7   : > { %v1231_v60 = vpop.permute.xlu0 %1230  ;;  %2407 = vrot.lane.b32.xlu0 %v2406_v59, %s2544_s9 }
 0x5b8   : > { %v2416_v63 = vpack.i.bf16 %v1231_v60, %v1229_v14 }
 0x5b9   : > { %v1234_v3 = vpop.permute.xlu1 %1233 }
 0x5ba   : > { %2412 = vrot.lane.b32.xlu1 %v2411_v62, %s2544_s9 }
 0x5bb   : > { %2417 = vrot.lane.b32.xlu0 %v2416_v63, %s2544_s9  ;;  %v2363_v8 = vpop.permute.xlu0 %2362 }
 0x5bc   : > { %v2365_v9 = vunpack.i.h.bf16 %v2363_v8  ;;  %v2364_v10 = vunpack.i.l.bf16 %v2363_v8 }
 0x5be   : > { %1263 = vrot.lane.b32.xlu1 %v1234_v3, %s2544_s9  ;;  %v911_v16 = vsel %vm554_vm8, %v2364_v10, %v2365_v9 }
 0x5bf   : > { %1102 = vrot.lane.b32.xlu0 %v2781_v42, %s2565_s7 }
 0x5c2   : > { %1235 = vrot.lane.b32.xlu1 %v2781_v42, %s2566_s10 }
 0x5c3   : > { %1180 = vperm.xlu0 %2421, %v2781_v42  }
 0x5c6   : > { %1351 = vperm.xlu1 %2422, %v2781_v42  }
 0x5c7   : > { %2424 = vset.pattern.permute.xlu0 %v2567_v6 }
 0x5c8   : > { %1356 = vperm.xlu0 %2424, %v2781_v42  }
 0x5ca   : > { %2423 = vset.pattern.permute.xlu1 %v2568_v7 }
 0x5cb   : > { %1185 = vperm.xlu1 %2423, %v2781_v42  }
 0x613   : > { %v2368_v11 = vpop.permute.xlu1 %2367 }
 0x614   : > { %v2370_v12 = vunpack.i.h.bf16 %v2368_v11  ;;  %v2369_v13 = vunpack.i.l.bf16 %v2368_v11 }
 0x615   : > { %v2373_v15 = vpop.permute.xlu0 %2372 }
 0x616   : > { %v912_v17 = vsel %vm554_vm8, %v2369_v13, %v2370_v12  ;;  %v2375_v18 = vunpack.i.h.bf16 %v2373_v15  ;;  %v2374_v19 = vunpack.i.l.bf16 %v2373_v15 }
 0x617   : > { %v2128_v20 = vpack.c.bf16 %v912_v17, %v911_v16  ;;  %v2378_v21 = vpop.permute.xlu1 %2377 }
 0x618   : > { %v2380_v24 = vunpack.i.h.bf16 %v2378_v21  ;;  %v2379_v26 = vunpack.i.l.bf16 %v2378_v21  ;;  %v913_v27 = vsel %vm554_vm8, %v2374_v19, %v2375_v18 }
 0x619   : > { %v2383_v0 = vpop.permute.xlu0 %2382  ;;  %2129 = vmatpush3.bf16.msra.mxu1 %v2128_v20 }
 0x61a   : > { %v914_v29 = vsel %vm554_vm8, %v2379_v26, %v2380_v24  ;;  %2130 = vmatprep.subr.bf16.mxu1 %v2536_v1  ;;  %v2385_v32 = vunpack.i.h.bf16 %v2383_v0  ;;  %v2384_v34 = vunpack.i.l.bf16 %v2383_v0 }
 0x61b   : > { %v2131_v30 = vpack.c.bf16 %v914_v29, %v913_v27 }
 0x61c   : > { %v2388_v36 = vpop.permute.xlu1 %2387  ;;  %v2134_v41 = vpack.c.bf16 %v2385_v32, %v2384_v34 }
 0x61d   : > { %2132 = vmatpush3.bf16.msra.mxu1 %v2131_v30  ;;  %v2393_v40 = vpop.permute.xlu0 %2392  ;;  %v2390_v43 = vunpack.i.h.bf16 %v2388_v36  ;;  %v2389_v44 = vunpack.i.l.bf16 %v2388_v36 }
 0x61e   : > { %2133 = vmatprep.subr.bf16.mxu1 %v2536_v1  ;;  %v2395_v48 = vunpack.i.h.bf16 %v2393_v40  ;;  %v2394_v49 = vunpack.i.l.bf16 %v2393_v40 }
 0x61f   : > { %v2137_v47 = vpack.c.bf16 %v2390_v43, %v2389_v44 }
 0x620   : > { %v878_v45 = vpop.permute.xlu1 %877  ;;  %v1265_v54 = vsel %vm554_vm8, %v2394_v49, %v2395_v48 }
 0x621   : > { %2135 = vmatpush3.bf16.msra.mxu1 %v2134_v41  ;;  %v910_v46 = vpop.permute.xlu0 %909 }
 0x622   : > { %2136 = vmatprep.subr.bf16.mxu1 %v2536_v1 }
 0x624   : > { %v2398_v50 = vpop.permute.xlu1 %2397 }
 0x625   : > { %v2400_v51 = vunpack.i.h.bf16 %v2398_v50  ;;  %v2399_v52 = vunpack.i.l.bf16 %v2398_v50  ;;  %2138 = vmatpush3.bf16.msra.mxu1 %v2137_v47  ;;  %v880_v53 = vpop.permute.xlu0 %879 }
 0x626   : > { %2011 = vmatprep.subr.mxu1 %v2537_v2  ;;  %v882_v14 = vsel %vm881_vm11, %v878_v45, %v880_v53  ;;  %v2905_v2 = vld [vmem:[#allocation2] sm:$0xff] }
 0x627   : > { %v1266_v55 = vsel %vm554_vm8, %v2399_v52, %v2400_v51 }
 0x628   : > { %v2146_v56 = vpack.c.bf16 %v1266_v55, %v1265_v54  ;;  %v2403_v59 = vpop.permute.xlu1 %2402 }
 0x629   : > { %v2405_v60 = vunpack.i.h.bf16 %v2403_v59  ;;  %v2404_v61 = vunpack.i.l.bf16 %v2403_v59  ;;  %2012 = vmatpush3.msra.mxu1 %v910_v46  ;;  %v2408_v62 = vpop.permute.xlu0 %2407 }
 0x62a   : > { %v2410_v63 = vunpack.i.h.bf16 %v2408_v62  ;;  %v2409_v3 = vunpack.i.l.bf16 %v2408_v62  ;;  %2014 = vmatmul.mubr.msk.f32.vlgmr.msra.gmra.mrb[2].mxu1 %vm568_vm10, %v882_v14  ;;  %2145 = vmatprep.subr.bf16.mxu1 %v2536_v1 }
 0x62b   : > { %v1267_v4 = vsel %vm554_vm8, %v2404_v61, %v2405_v60  ;;  %2147 = vmatpush3.bf16.msra.mxu1 %v2146_v56  ;;  %2052 = vmatprep.mubr.msk.f32.mxu1 %vm2538_vm0, %v2905_v2 }
 0x62c   : > { %v1268_v5 = vsel %vm554_vm8, %v2409_v3, %v2410_v63  ;;  %v2413_v6 = vpop.permute.xlu1 %2412  ;;  %2148 = vmatprep.subr.bf16.mxu1 %v2536_v1 }
 0x62d   : > { %v2149_v7 = vpack.c.bf16 %v1268_v5, %v1267_v4  ;;  %v2415_v8 = vunpack.i.h.bf16 %v2413_v6  ;;  %v2414_v9 = vunpack.i.l.bf16 %v2413_v6  ;;  %v2418_v10 = vpop.permute.xlu0 %2417 }
 0x62e   : > { %v2420_v12 = vunpack.i.h.bf16 %v2418_v10  ;;  %v2419_v13 = vunpack.i.l.bf16 %v2418_v10 }
 0x62f   : > { %2150 = vmatpush3.bf16.msra.mxu1 %v2149_v7  ;;  %v2152_v11 = vpack.c.bf16 %v2415_v8, %v2414_v9 }
 0x630   : > { %2151 = vmatprep.subr.bf16.mxu1 %v2536_v1  ;;  %v2155_v16 = vpack.c.bf16 %v2420_v12, %v2419_v13  ;;  %v1264_v17 = vpop.permute.xlu1 %1263 }
 0x631   : > { %v1103_v15 = vpop.permute.xlu0 %1102 }
 0x632   : > { %2032 = vmatmul.mubr.msk.f32.vlgmr.msra.gmra.mrb[8].mxu0 %vm361_vm9, %v1103_v15 }
 0x633   : > { %2153 = vmatpush3.bf16.msra.mxu1 %v2152_v11  ;;  %2073 = vmatprep.mubr.msk.f32.mxu0 %vm2538_vm0, %v2905_v2 }
 0x634   : > { %2154 = vmatprep.subr.bf16.mxu1 %v2536_v1  ;;  %v1236_v18 = vpop.permute.xlu1 %1235 }
 0x637   : > { %2156 = vmatpush3.bf16.msra.mxu1 %v2155_v16 }
 0x638   : > { %2050 = vmatprep.subr.mxu1 %v2905_v2 }
 0x63b   : > { %2051 = vmatpush3.msra.mxu1 %v1264_v17 }
 0x63c   : > { %2053 = vmatmul.mubr.msk.f32.vlgmr.msra.gmra.mrb[4].mxu1 %vm568_vm10, %v1236_v18  ;;  %2169 = vmatprep.subr.bf16.mxu1 %v2536_v1  ;;  %v2959_v18 = vld [vmem:[%s3045_s2 + $0x8] sm:$0xff] }
 0x63d   : > { %2094 = vmatprep.mubr.msk.f32.mxu1 %vm2538_vm0, %v2905_v2 }
 0x642   : > { %v1181_v0 = vpop.permute.xlu0 %1180 }
 0x645   : > { %v1352_v26 = vpop.permute.xlu1 %1351 }
 0x647   : > { %v1357_v32 = vpop.permute.xlu0 %1356 }
 0x64a   : > { %v1186_v29 = vpop.permute.xlu1 %1185 }
 0x6fd   : > { %v2921_v19 = vpop.f32.mrb[2].mxu1 }
 0x6fe   : > { %v2015_v20 = vpop.f32.mrb[3].mxu1 }
 0x6ff   : > { %v2569_v20 = vmov 6  }
 0x700   : > { %2470 = vset.pattern.permute.xlu1 %v2569_v20 }
 0x705   : > { %v1175_v21 = vpop.f32.mrb[8].mxu0 }
 0x706   : > { %v2033_v24 = vpop.f32.mrb[9].mxu0  ;;  %v1183_v27 = vmul.f32 %v1181_v0, %v1175_v21  ;;  %v2570_v21 = vmov 7  }
 0x707   : > { %2471 = vset.pattern.permute.xlu0 %v2570_v21  ;;  %v2968_v24 = vld [vmem:[%s3045_s2 + $0x10] sm:$0xff] }
 0x708   : > { %v1188_v40 = vadd.f32 %v1186_v29, %v1183_v27 }
 0x70f   : > { %v1346_v30 = vpop.f32.mrb[4].mxu1 }
 0x710   : > { %v1354_v34 = vmul.f32 %v1352_v26, %v1346_v30  ;;  %v2054_v36 = vpop.f32.mrb[5].mxu1 }
 0x712   : > { %v1359_v41 = vadd.f32 %v1357_v32, %v1354_v34 }
 0x714   : > { %v2923_v43 = vadd.f32 %v1359_v41, %v1188_v40 }
 0x716   : > { %v1361_v44 = vmax.f32 %v2923_v43, 0.0 }
 0x718   : > { %1365 = vst.msk [vmem:[#allocation2 + $0x8] sm:$0xff] %vm259_vm2, %v1361_v44 }
 0x71f   : > { %v1367_v45 = vld [vmem:[#allocation2 + $0x8] sm:$0xff] }
 0x720   : > { %v2425_v46 = vpack.i.bf16 %v1367_v45, %v2905_v2  ;;  %v1373_v47 = vmul.f32 %v1367_v45, %v2665_v23  ;;  %v1371_v48 = vmul.f32 %v1367_v45, %v2662_v22  ;;  %v1374_v51 = vmul.f32 %v1367_v45, %v2682_v33 }
 0x721   : > { %v1369_v52 = vmul.f32 %v1367_v45, %v2687_v35  ;;  %v1375_v53 = vmul.f32 %v1367_v45, %v2678_v31  ;;  %v1376_v55 = vmul.f32 %v1367_v45, %v2691_v37 }
 0x722   : > { %2426 = vrot.lane.b32.xlu1 %v2425_v46, %s2543_s8  ;;  %v2435_v49 = vpack.i.bf16 %v1373_v47, %v2673_v28  ;;  %v2430_v50 = vpack.i.bf16 %v1371_v48, %v2668_v25 }
 0x723   : > { %v2440_v54 = vpack.i.bf16 %v1369_v52, %v2695_v38 }
 0x724   : > { %2436 = vrot.lane.b32.xlu0 %v2435_v49, %s2548_s13 }
 0x726   : > { %2431 = vrot.lane.b32.xlu1 %v2430_v50, %s2547_s12 }
 0x728   : > { %1401 = vrot.lane.b32.xlu0 %v1374_v51, %s2535_s22 }
 0x72a   : > { %1398 = vrot.lane.b32.xlu1 %v1367_v45, %s2546_s11 }
 0x72c   : > { %1406 = vrot.lane.b32.xlu0 %v1367_v45, %s2550_s15 }
 0x72e   : > { %1404 = vrot.lane.b32.xlu1 %v1375_v53, %s2549_s14 }
 0x730   : > { %2441 = vrot.lane.b32.xlu0 %v2440_v54, %s2544_s9 }
 0x732   : > { %1409 = vrot.lane.b32.xlu1 %v1376_v55, %s2551_s16 }
 0x794   : > { %v2427_v56 = vpop.permute.xlu1 %2426 }
 0x795   : > { %v2429_v59 = vunpack.i.h.bf16 %v2427_v56  ;;  %v2428_v14 = vunpack.i.l.bf16 %v2427_v56 }
 0x796   : > { %v2437_v60 = vpop.permute.xlu0 %2436 }
 0x797   : > { %v1383_v61 = vsel %vm493_vm5, %v2428_v14, %v2429_v59  ;;  %v2439_v62 = vunpack.i.h.bf16 %v2437_v60  ;;  %v2438_v63 = vunpack.i.l.bf16 %v2437_v60 }
 0x798   : > { %v2445_v3 = vpack.i.bf16 %v2429_v59, %v1383_v61  ;;  %v2432_v4 = vpop.permute.xlu1 %2431 }
 0x799   : > { %v1397_v5 = vsel %vm509_vm7, %v2438_v63, %v2439_v62  ;;  %v2434_v6 = vunpack.i.h.bf16 %v2432_v4  ;;  %v2433_v7 = vunpack.i.l.bf16 %v2432_v4 }
 0x79a   : > { %v1402_v8 = vpop.permute.xlu0 %1401  ;;  %2446 = vrot.lane.b32.xlu1 %v2445_v3, %s2544_s9  ;;  %v2455_v10 = vpack.i.bf16 %v2439_v62, %v1397_v5 }
 0x79b   : > { %v1390_v9 = vsel %vm501_vm6, %v2433_v7, %v2434_v6 }
 0x79c   : > { %v2450_v11 = vpack.i.bf16 %v2434_v6, %v1390_v9  ;;  %v1399_v12 = vpop.permute.xlu1 %1398 }
 0x79d   : > { %v2460_v13 = vpack.i.bf16 %v1402_v8, %v1399_v12 }
 0x79e   : > { %2456 = vrot.lane.b32.xlu1 %v2455_v10, %s2544_s9  ;;  %2451 = vrot.lane.b32.xlu0 %v2450_v11, %s2544_s9  ;;  %v1407_v15 = vpop.permute.xlu0 %1406 }
 0x7a0   : > { %v1405_v16 = vpop.permute.xlu1 %1404 }
 0x7a1   : > { %v2465_v17 = vpack.i.bf16 %v1407_v15, %v1405_v16 }
 0x7a2   : > { %2461 = vrot.lane.b32.xlu0 %v2460_v13, %s2544_s9  ;;  %v2442_v0 = vpop.permute.xlu0 %2441 }
 0x7a3   : > { %2466 = vrot.lane.b32.xlu1 %v2465_v17, %s2544_s9  ;;  %v2444_v27 = vunpack.i.h.bf16 %v2442_v0  ;;  %v2443_v29 = vunpack.i.l.bf16 %v2442_v0 }
 0x7a4   : > { %v1410_v26 = vpop.permute.xlu1 %1409 }
 0x7a5   : > { %v1447_v34 = vsel %vm554_vm8, %v2443_v29, %v2444_v27 }
 0x7a6   : > { %1413 = vrot.lane.b32.xlu0 %v2781_v42, %s2554_s17 }
 0x7a7   : > { %1415 = vrot.lane.b32.xlu1 %v2959_v18, %s2554_s17 }
 0x7aa   : > { %1445 = vrot.lane.b32.xlu0 %v1410_v26, %s2544_s9  ;;  %v2571_v26 = vmov 18  }
 0x7ab   : > { %1534 = vperm.xlu1 %2470, %v2968_v24  }
 0x7ae   : > { %1539 = vperm.xlu0 %2471, %v2968_v24  }
 0x7af   : > { %2517 = vset.pattern.permute.xlu1 %v2571_v26 }
 0x80c   : > { %v2447_v30 = vpop.permute.xlu1 %2446 }
 0x80d   : > { %v2449_v42 = vunpack.i.h.bf16 %v2447_v30  ;;  %v2448_v32 = vunpack.i.l.bf16 %v2447_v30 }
 0x80f   : > { %v1448_v36 = vsel %vm554_vm8, %v2448_v32, %v2449_v42 }
 0x810   : > { %v2158_v40 = vpack.c.bf16 %v1448_v36, %v1447_v34  ;;  %v2457_v41 = vpop.permute.xlu1 %2456  ;;  %v2452_v45 = vpop.permute.xlu0 %2451 }
 0x811   : > { %v2459_v46 = vunpack.i.h.bf16 %v2457_v41  ;;  %v2458_v47 = vunpack.i.l.bf16 %v2457_v41  ;;  %v2454_v48 = vunpack.i.h.bf16 %v2452_v45  ;;  %v2453_v49 = vunpack.i.l.bf16 %v2452_v45 }
 0x812   : > { %2159 = vmatpush3.bf16.msra.mxu0 %v2158_v40 }
 0x813   : > { %v1450_v50 = vsel %vm554_vm8, %v2458_v47, %v2459_v46  ;;  %v1449_v51 = vsel %vm554_vm8, %v2453_v49, %v2454_v48  ;;  %2160 = vmatprep.subr.bf16.mxu0 %v2536_v1 }
 0x814   : > { %v2161_v52 = vpack.c.bf16 %v1450_v50, %v1449_v51  ;;  %v2462_v53 = vpop.permute.xlu0 %2461 }
 0x815   : > { %v2464_v54 = vunpack.i.h.bf16 %v2462_v53  ;;  %v2463_v55 = vunpack.i.l.bf16 %v2462_v53  ;;  %v2467_v56 = vpop.permute.xlu1 %2466  ;;  %v2574_v53 = vmov 8  }
 0x816   : > { %2162 = vmatpush3.bf16.msra.mxu0 %v2161_v52  ;;  %v2469_v14 = vunpack.i.h.bf16 %v2467_v56  ;;  %v2468_v60 = vunpack.i.l.bf16 %v2467_v56 }
 0x817   : > { %v2164_v59 = vpack.c.bf16 %v2464_v54, %v2463_v55  ;;  %2163 = vmatprep.subr.bf16.mxu0 %v2536_v1  ;;  %v2575_v54 = vmov 9  }
 0x818   : > { %v1414_v61 = vpop.permute.xlu0 %1413  ;;  %v2167_v62 = vpack.c.bf16 %v2469_v14, %v2468_v60 }
 0x819   : > { %v1416_v63 = vpop.permute.xlu1 %1415 }
 0x81a   : > { %2165 = vmatpush3.bf16.msra.mxu0 %v2164_v59  ;;  %v1418_v4 = vsel %vm1417_vm12, %v1414_v61, %v1416_v63 }
 0x81b   : > { %2166 = vmatprep.subr.bf16.mxu0 %v2536_v1 }
 0x81c   : > { %v1446_v3 = vpop.permute.xlu0 %1445 }
 0x81e   : > { %2168 = vmatpush3.bf16.msra.mxu0 %v2167_v62 }
 0x81f   : > { %2071 = vmatprep.subr.mxu0 %v2905_v2 }
 0x822   : > { %2072 = vmatpush3.msra.mxu0 %v1446_v3 }
 0x823   : > { %2074 = vmatmul.mubr.msk.f32.vlgmr.msra.gmra.mrb[10].mxu0 %vm568_vm10, %v1418_v4 }
 0x82a   : > { %v1535_v5 = vpop.permute.xlu1 %1534 }
 0x82d   : > { %v1540_v7 = vpop.permute.xlu0 %1539 }
 0x8f6   : > { %v1528_v6 = vpop.f32.mrb[10].mxu0 }
 0x8f7   : > { %v1537_v8 = vmul.f32 %v1535_v5, %v1528_v6  ;;  %v2075_v9 = vpop.f32.mrb[11].mxu0 }
 0x8f9   : > { %v1542_v10 = vadd.f32 %v1540_v7, %v1537_v8 }
 0x8fb   : > { %v1543_v11 = vmax.f32 %v1542_v10, 0.0 }
 0x8fd   : > { %1546 = vst.msk [vmem:[#allocation2 + $0x8] sm:$0xff] %vm259_vm2, %v1543_v11 }
 0x904   : > { %v1548_v12 = vld [vmem:[#allocation2 + $0x8] sm:$0xff] }
 0x905   : > { %v2472_v13 = vpack.i.bf16 %v1548_v12, %v2905_v2  ;;  %v1554_v15 = vmul.f32 %v1548_v12, %v2665_v23  ;;  %v1552_v16 = vmul.f32 %v1548_v12, %v2662_v22  ;;  %v1555_v21 = vmul.f32 %v1548_v12, %v2682_v33 }
 0x906   : > { %v1550_v22 = vmul.f32 %v1548_v12, %v2687_v35  ;;  %v1556_v23 = vmul.f32 %v1548_v12, %v2678_v31  ;;  %v1557_v33 = vmul.f32 %v1548_v12, %v2691_v37 }
 0x907   : > { %2473 = vrot.lane.b32.xlu1 %v2472_v13, %s2543_s8  ;;  %v2482_v17 = vpack.i.bf16 %v1554_v15, %v2673_v28  ;;  %v2477_v20 = vpack.i.bf16 %v1552_v16, %v2668_v25  ;;  %v2572_v28 = vmov 19   ;;  %s1838_s8 = sshll.u32 %s3050_s19, 3 }
 0x908   : > { %2518 = vset.pattern.permute.xlu0 %v2572_v28  ;;  %v2487_v25 = vpack.i.bf16 %v1550_v22, %v2695_v38 }
 0x909   : > { %2483 = vrot.lane.b32.xlu0 %v2482_v17, %s2548_s13 }
 0x90b   : > { %2478 = vrot.lane.b32.xlu1 %v2477_v20, %s2547_s12  ;;  %s253_s12 = scalar_lea.vmem %s3048_s5, %s1838_s8 }
 0x90d   : > { %1582 = vrot.lane.b32.xlu0 %v1555_v21, %s2535_s22  ;;  %s2573_s22 = smov 66  }
 0x90f   : > { %1579 = vrot.lane.b32.xlu1 %v1548_v12, %s2546_s11 }
 0x911   : > { %1587 = vrot.lane.b32.xlu0 %v1548_v12, %s2550_s15 }
 0x913   : > { %1585 = vrot.lane.b32.xlu1 %v1556_v23, %s2549_s14  ;;  %s249_s14 = scalar_lea.vmem %s3047_s4, %s1838_s8 }
 0x915   : > { %2488 = vrot.lane.b32.xlu0 %v2487_v25, %s2544_s9 }
 0x917   : > { %1590 = vrot.lane.b32.xlu1 %v1557_v33, %s2551_s16 }
 0x979   : > { %v2474_v0 = vpop.permute.xlu1 %2473 }
 0x97a   : > { %v2476_v27 = vunpack.i.h.bf16 %v2474_v0  ;;  %v2475_v29 = vunpack.i.l.bf16 %v2474_v0 }
 0x97b   : > { %v2484_v35 = vpop.permute.xlu0 %2483 }
 0x97c   : > { %v1564_v30 = vsel %vm493_vm5, %v2475_v29, %v2476_v27  ;;  %v2486_v42 = vunpack.i.h.bf16 %v2484_v35  ;;  %v2485_v31 = vunpack.i.l.bf16 %v2484_v35 }
 0x97d   : > { %v2492_v32 = vpack.i.bf16 %v2476_v27, %v1564_v30  ;;  %v2479_v34 = vpop.permute.xlu1 %2478 }
 0x97e   : > { %v1578_v36 = vsel %vm509_vm7, %v2485_v31, %v2486_v42  ;;  %v2481_v40 = vunpack.i.h.bf16 %v2479_v34  ;;  %v2480_v38 = vunpack.i.l.bf16 %v2479_v34 }
 0x97f   : > { %v1583_v41 = vpop.permute.xlu0 %1582  ;;  %2493 = vrot.lane.b32.xlu1 %v2492_v32, %s2544_s9  ;;  %v2502_v45 = vpack.i.bf16 %v2486_v42, %v1578_v36 }
 0x980   : > { %v1571_v37 = vsel %vm501_vm6, %v2480_v38, %v2481_v40 }
 0x981   : > { %v2497_v46 = vpack.i.bf16 %v2481_v40, %v1571_v37  ;;  %v1580_v47 = vpop.permute.xlu1 %1579 }
 0x982   : > { %v2507_v48 = vpack.i.bf16 %v1583_v41, %v1580_v47 }
 0x983   : > { %2503 = vrot.lane.b32.xlu1 %v2502_v45, %s2544_s9  ;;  %2498 = vrot.lane.b32.xlu0 %v2497_v46, %s2544_s9  ;;  %v1588_v49 = vpop.permute.xlu0 %1587 }
 0x985   : > { %v1586_v50 = vpop.permute.xlu1 %1585 }
 0x986   : > { %v2512_v51 = vpack.i.bf16 %v1588_v49, %v1586_v50 }
 0x987   : > { %2508 = vrot.lane.b32.xlu0 %v2507_v48, %s2544_s9  ;;  %v2489_v55 = vpop.permute.xlu0 %2488 }
 0x988   : > { %2513 = vrot.lane.b32.xlu1 %v2512_v51, %s2544_s9  ;;  %v2490_v56 = vunpack.i.l.bf16 %v2489_v55 }
 0x989   : > { %v1591_v52 = vpop.permute.xlu1 %1590 }
 0x98b   : > { %1594 = vrot.lane.b32.xlu0 %v2959_v18, %s2573_s22  ;;  %v2491_v18 = vunpack.i.h.bf16 %v2489_v55 }
 0x98c   : > { %1596 = vrot.lane.b32.xlu1 %v2968_v24, %s2573_s22 }
 0x98d   : > { %v1628_v61 = vsel %vm554_vm8, %v2490_v56, %v2491_v18 }
 0x98f   : > { %1626 = vrot.lane.b32.xlu0 %v1591_v52, %s2544_s9 }
 0x990   : > { %997 = vperm.xlu1 %2517, %v2774_v39  }
 0x993   : > { %1002 = vperm.xlu0 %2518, %v2774_v39  }
 0x994   : > { %2519 = vset.pattern.permute.xlu1 %v2574_v53 }
 0x995   : > { %1714 = vperm.xlu1 %2519, %v2968_v24  }
 0x997   : > { %2521 = vset.pattern.permute.xlu0 %v2575_v54 }
 0x999   : > { %2520 = vset.pattern.permute.xlu1 %v2575_v54 }
 0x99a   : > { %1719 = vperm.xlu1 %2520, %v2968_v24  }
 0x9f1   : > { %v2494_v59 = vpop.permute.xlu1 %2493 }
 0x9f2   : > { %v2496_v14 = vunpack.i.h.bf16 %v2494_v59  ;;  %v2495_v60 = vunpack.i.l.bf16 %v2494_v59 }
 0x9f4   : > { %v1629_v62 = vsel %vm554_vm8, %v2495_v60, %v2496_v14 }
 0x9f5   : > { %v2170_v39 = vpack.c.bf16 %v1629_v62, %v1628_v61  ;;  %v2504_v63 = vpop.permute.xlu1 %2503  ;;  %v2499_v3 = vpop.permute.xlu0 %2498 }
 0x9f6   : > { %v2506_v4 = vunpack.i.h.bf16 %v2504_v63  ;;  %v2505_v5 = vunpack.i.l.bf16 %v2504_v63  ;;  %v2501_v6 = vunpack.i.h.bf16 %v2499_v3  ;;  %v2500_v7 = vunpack.i.l.bf16 %v2499_v3 }
 0x9f7   : > { %2171 = vmatpush3.bf16.msra.mxu1 %v2170_v39 }
 0x9f8   : > { %v1631_v24 = vsel %vm554_vm8, %v2505_v5, %v2506_v4  ;;  %v1630_v8 = vsel %vm554_vm8, %v2500_v7, %v2501_v6  ;;  %2172 = vmatprep.subr.bf16.mxu1 %v2536_v1 }
 0x9f9   : > { %v2173_v9 = vpack.c.bf16 %v1631_v24, %v1630_v8  ;;  %v2509_v10 = vpop.permute.xlu0 %2508 }
 0x9fa   : > { %v2511_v11 = vunpack.i.h.bf16 %v2509_v10  ;;  %v2510_v12 = vunpack.i.l.bf16 %v2509_v10  ;;  %v2514_v13 = vpop.permute.xlu1 %2513 }
 0x9fb   : > { %2174 = vmatpush3.bf16.msra.mxu1 %v2173_v9  ;;  %v2516_v16 = vunpack.i.h.bf16 %v2514_v13  ;;  %v2515_v17 = vunpack.i.l.bf16 %v2514_v13 }
 0x9fc   : > { %v2176_v15 = vpack.c.bf16 %v2511_v11, %v2510_v12  ;;  %2175 = vmatprep.subr.bf16.mxu1 %v2536_v1 }
 0x9fd   : > { %v1595_v20 = vpop.permute.xlu0 %1594  ;;  %v2179_v21 = vpack.c.bf16 %v2516_v16, %v2515_v17 }
 0x9fe   : > { %v1597_v26 = vpop.permute.xlu1 %1596 }
 0x9ff   : > { %2177 = vmatpush3.bf16.msra.mxu1 %v2176_v15  ;;  %v1599_v23 = vsel %vm1598_vm13, %v1595_v20, %v1597_v26 }
 0xa00   : > { %2178 = vmatprep.subr.bf16.mxu1 %v2536_v1 }
 0xa01   : > { %v1627_v22 = vpop.permute.xlu0 %1626 }
 0xa03   : > { %2180 = vmatpush3.bf16.msra.mxu1 %v2179_v21 }
 0xa04   : > { %2092 = vmatprep.subr.mxu1 %v2905_v2 }
 0xa07   : > { %2093 = vmatpush3.msra.mxu1 %v1627_v22 }
 0xa08   : > { %2095 = vmatmul.mubr.msk.f32.vlgmr.msra.gmra.mrb[6].mxu1 %vm568_vm10, %v1599_v23 }
 0xa0f   : > { %v998_v28 = vpop.permute.xlu1 %997 }
 0xa10   : > { %v1000_v25 = vmul.f32 %v998_v28, %v2921_v19 }
 0xa12   : > { %v1003_v33 = vpop.permute.xlu0 %1002 }
 0xa13   : > { %v1005_v0 = vadd.f32 %v1003_v33, %v1000_v25 }
 0xa14   : > { %v1715_v30 = vpop.permute.xlu1 %1714 }
 0xa15   : > { %v1006_v1 = vadd.f32 %v1005_v0, %v652_v58 }
 0xa17   : > { %v1007_v27 = vmax.f32 %v1006_v1, 0.0 }
 0xa19   : > { %1734 = vst.msk [vmem:[%s253_s12] sm:$0xff] %vm259_vm2, %v1007_v27  ;;  %v1856_v2 = vmul.f32 -1.442695, %v1007_v27  ;;  %v1720_v42 = vpop.permute.xlu1 %1719 }
 0xa1b   : > { %2522 = vpow2.f32 %v1856_v2 }
 0xa25   : > { %v2523_v29 = vpop.eup %2522 }
 0xa26   : > { %v1728_v35 = vadd.f32 1.0, %v2523_v29 }
 0xa28   : > { %2524 = vrcp.f32 %v1728_v35 }
 0xa32   : > { %v2525_v36 = vpop.eup %2524 }
 0xadb   : > { %v1709_v19 = vpop.f32.mrb[6].mxu1 }
 0xadc   : > { %v1717_v31 = vmul.f32 %v1715_v30, %v1709_v19  ;;  %v2096_v32 = vpop.f32.mrb[7].mxu1 }
 0xade   : > { %v1722_v34 = vadd.f32 %v1720_v42, %v1717_v31 }
 0xae0   : > { %v1723_v57 = vadd.f32 %v1722_v34, %v1361_v44 }
 0xae2   : > { %v1724_v58 = vmax.f32 %v1723_v57, 0.0 }
 0xae4   : > { %v1731_v40 = vmul.f32 %v2525_v36, %v1724_v58 }
 0xae6   : > { %v1732_v38 = vadd.f32 %v1731_v40, %v1724_v58 }
 0xae8   : > { %1733 = vst.msk [vmem:[%s249_s14] sm:$0xff] %vm259_vm2, %v1732_v38 }
 0xae9 PF: > { %s16_s18 = sadd.s32 1, %s2533_s18  }
 0xaea   : > { %p13_p4 = scmp.ge.s32.totalorder %s16_s18, 4  }
 0xaec   :  { %15 = sbr.rel (!%p13_p4) target bundleno = 1 (0x1), region = 81 }

</bundles_post_ra>
